<compile_context>
chip_gen: v7x
topology: tpu7x:2x2x1
jax: 0.10.0
libtpu: 0.0.40
codegen_flags: <defaults>
</compile_context>

<pallas_src>
import functools
from typing import Optional

import jax
import jax.numpy as jnp
from jax.experimental import pallas as pl
from jax.experimental.pallas import tpu as pltpu


# ----------------------------------------------------------------------------
# PyTorch helper reproduced exactly
# ----------------------------------------------------------------------------
def make_divisible(value: float, divisor: int, min_value: Optional[float] = None,
                   round_down_protect: bool = True) -> int:
    if min_value is None:
        min_value = divisor
    new_value = max(min_value, int(value + divisor / 2) // divisor * divisor)
    if round_down_protect and new_value < 0.9 * value:
        new_value += divisor
    return int(new_value)


def _conv_out(n, k, p, s):
    return (n + 2 * p - k) // s + 1


# ----------------------------------------------------------------------------
# In-kernel helpers
# ----------------------------------------------------------------------------
def _dw_tap(ref, kh, kw, oh, ow, stride):
    """One depthwise tap: (oh, ow, C) slab read at the strided output positions."""
    if stride == 1:
        return ref[pl.ds(kh, oh), pl.ds(kw, ow), :]
    return ref[pl.ds(kh, oh, stride), pl.ds(kw, ow, stride), :]


def _zero_halo(ref, p, h, w, c, dtype):
    """Zero only the halo border strips of a padded (h+2p, w+2p, c) scratch."""
    if p == 0:
        return
    hp, wp = h + 2 * p, w + 2 * p
    zrow = jnp.zeros((p, wp, c), dtype)
    ref[pl.ds(0, p), :, :] = zrow
    ref[pl.ds(p + h, p), :, :] = zrow
    zcol = jnp.zeros((hp, p, c), dtype)
    ref[:, pl.ds(0, p), :] = zcol
    ref[:, pl.ds(p + w, p), :] = zcol


# ----------------------------------------------------------------------------
# Fused UIB forward (single Pallas kernel, grid over batch)
# ----------------------------------------------------------------------------
@functools.partial(jax.jit, static_argnames=("start_k", "middle_k",
                                              "middle_dw_downsample", "stride",
                                              "pw_dtype"))
def uib_forward_pallas(x_nchw, params, *, start_k, middle_k,
                       middle_dw_downsample, stride, pw_dtype=jnp.bfloat16):
    f32 = jnp.float32
    N, Cin, H, W = x_nchw.shape

    has_start = bool(start_k)
    has_middle = bool(middle_k)
    # Matches the PyTorch module: a stage that does not exist never applies its
    # stride (so e.g. no start dw + middle_dw_downsample=False keeps full res).
    s_start = stride if (has_start and not middle_dw_downsample) else 1
    s_mid = stride if (has_middle and middle_dw_downsample) else 1

    Cexp = params["expand_w"].shape[1]
    Cout = params["proj_w"].shape[1]

    p0 = (start_k - 1) // 2 if has_start else 0
    p1 = (middle_k - 1) // 2 if has_middle else 0
    Ha = _conv_out(H, start_k, p0, s_start) if has_start else H
    Wa = _conv_out(W, start_k, p0, s_start) if has_start else W
    Hm = _conv_out(Ha, middle_k, p1, s_mid) if has_middle else Ha
    Wm = _conv_out(Wa, middle_k, p1, s_mid) if has_middle else Wa

    # ---- fold eval-mode BatchNorm into the conv weights / bias ----
    def fold_dw(w, bn):                       # depthwise: w (K, K, C), f32 math
        sc, sh = bn
        return (w.astype(f32) * sc.reshape(1, 1, -1).astype(f32)), sh.astype(f32)

    def fold_pw(w, bn):                       # pointwise: w (Cin, Cout) -> MXU dtype
        sc, sh = bn
        wf = w.astype(f32) * sc.reshape(1, -1).astype(f32)
        return wf.astype(pw_dtype), sh.astype(f32)

    # ---- assemble kernel operands + BlockSpecs ----
    inputs, in_specs = [], []

    def add_full(arr):                        # whole-array operand (weights/bias)
        inputs.append(arr)
        nd = arr.ndim
        in_specs.append(pl.BlockSpec(arr.shape, lambda n, nd=nd: (0,) * nd))

    x_nhwc = jnp.transpose(x_nchw, (0, 2, 3, 1)).astype(f32)   # NCHW -> NHWC
    inputs.append(x_nhwc)
    in_specs.append(pl.BlockSpec((1, H, W, Cin), lambda n: (n, 0, 0, 0)))

    if has_start:
        w0, b0 = fold_dw(params["start_dw_w"], params["start_dw_bn"])
        add_full(w0); add_full(b0)
    w1, b1 = fold_pw(params["expand_w"], params["expand_bn"])
    add_full(w1); add_full(b1)
    if has_middle:
        w2, b2 = fold_dw(params["middle_dw_w"], params["middle_dw_bn"])
        add_full(w2); add_full(b2)
    w3, b3 = fold_pw(params["proj_w"], params["proj_bn"])
    add_full(w3); add_full(b3)

    # ---- VMEM scratch: just the two zero-padded depthwise input tiles ----
    scratch_shapes = []
    if has_start:
        scratch_shapes.append(pltpu.VMEM((H + 2 * p0, W + 2 * p0, Cin), f32))
    if has_middle:
        scratch_shapes.append(pltpu.VMEM((Ha + 2 * p1, Wa + 2 * p1, Cexp), f32))

    def kernel(*refs):
        refs = list(refs)
        x_ref = refs.pop(0)
        if has_start:
            w0_ref, b0_ref = refs.pop(0), refs.pop(0)
        w1_ref, b1_ref = refs.pop(0), refs.pop(0)
        if has_middle:
            w2_ref, b2_ref = refs.pop(0), refs.pop(0)
        w3_ref, b3_ref = refs.pop(0), refs.pop(0)
        o_ref = refs.pop(0)
        scratch = refs                        # remaining: VMEM scratch refs
        si = 0

        xv = x_ref[0]                         # (H, W, Cin) f32

        # -------- start depthwise (folded BN, no activation), strided taps ----
        if has_start:
            xpad_ref = scratch[si]; si += 1
            _zero_halo(xpad_ref, p0, H, W, Cin, f32)
            xpad_ref[pl.ds(p0, H), pl.ds(p0, W), :] = xv
            w0v = w0_ref[...]                 # (K, K, Cin)
            acc = jnp.zeros((Ha, Wa, Cin), f32)
            for kh in range(start_k):
                for kw in range(start_k):
                    acc = acc + _dw_tap(xpad_ref, kh, kw, Ha, Wa, s_start) \
                                * w0v[kh, kw, :]
            cur_hwc = acc + b0_ref[0]
        else:
            cur_hwc = xv

        # -------- expand 1x1 (folded BN) + ReLU6: 2-D MXU dot, M = Ha*Wa ------
        cur = jnp.reshape(cur_hwc, (Ha * Wa, Cin)).astype(pw_dtype)
        y1 = jnp.dot(cur, w1_ref[...], preferred_element_type=f32) + b1_ref[...]
        y1 = jnp.clip(y1, 0.0, 6.0)           # (Ha*Wa, Cexp) f32

        # -------- middle depthwise (folded BN) + ReLU6, strided taps ----------
        if has_middle:
            mpad_ref = scratch[si]; si += 1
            _zero_halo(mpad_ref, p1, Ha, Wa, Cexp, f32)
            mpad_ref[pl.ds(p1, Ha), pl.ds(p1, Wa), :] = \
                jnp.reshape(y1, (Ha, Wa, Cexp))
            w2v = w2_ref[...]                 # (K, K, Cexp)
            acc = jnp.zeros((Hm, Wm, Cexp), f32)
            for kh in range(middle_k):
                for kw in range(middle_k):
                    acc = acc + _dw_tap(mpad_ref, kh, kw, Hm, Wm, s_mid) \
                                * w2v[kh, kw, :]
            y2hwc = jnp.clip(acc + b2_ref[0], 0.0, 6.0)
            y2 = jnp.reshape(y2hwc, (Hm * Wm, Cexp))
        else:
            y2 = y1                           # (Hm*Wm, Cexp)

        # -------- projection 1x1 (folded BN, no activation) -------------------
        out = jnp.dot(y2.astype(pw_dtype), w3_ref[...],
                      preferred_element_type=f32) + b3_ref[...]
        # Channel-major store: (Cout, Hm*Wm) reshapes straight to NCHW outside.
        o_ref[0] = jnp.transpose(out, (1, 0)).astype(o_ref.dtype)

    out_flat = pl.pallas_call(
        kernel,
        out_shape=jax.ShapeDtypeStruct((N, Cout, Hm * Wm), f32),
        grid=(N,),
        in_specs=in_specs,
        out_specs=pl.BlockSpec((1, Cout, Hm * Wm), lambda n: (n, 0, 0)),
        scratch_shapes=scratch_shapes,
        compiler_params=pltpu.CompilerParams(
            dimension_semantics=("parallel",),        # batch across TCs
            vmem_limit_bytes=32 * 1024 * 1024),
    )(*inputs)

    return out_flat.reshape(N, Cout, Hm, Wm)          # already NCHW


# ----------------------------------------------------------------------------
# Parameter construction (deterministic, eval-mode BN)
# ----------------------------------------------------------------------------
def folded_bn(key, c, eps=1e-5):
    k1, k2, k3, k4 = jax.random.split(key, 4)
    gamma = jax.random.uniform(k1, (c,), jnp.float32, 0.5, 1.5)
    beta = jax.random.normal(k2, (c,), jnp.float32) * 0.1
    mean = jax.random.normal(k3, (c,), jnp.float32) * 0.1
    var = jax.random.uniform(k4, (c,), jnp.float32, 0.5, 1.5)
    scale = gamma / jnp.sqrt(var + eps)
    shift = beta - mean * scale
    return scale.reshape(1, c), shift.reshape(1, c)


def init_params(key, inp, oup, start_k, middle_k, expand_ratio):
    expand_filters = make_divisible(inp * expand_ratio, 8)
    keys = jax.random.split(key, 8)
    params = {}
    if start_k:
        params["start_dw_w"] = jax.random.normal(
            keys[0], (start_k, start_k, inp), jnp.float32) * 0.1
        params["start_dw_bn"] = folded_bn(keys[1], inp)
    params["expand_w"] = jax.random.normal(
        keys[2], (inp, expand_filters), jnp.float32) * 0.1
    params["expand_bn"] = folded_bn(keys[3], expand_filters)
    if middle_k:
        params["middle_dw_w"] = jax.random.normal(
            keys[4], (middle_k, middle_k, expand_filters), jnp.float32) * 0.1
        params["middle_dw_bn"] = folded_bn(keys[5], expand_filters)
    params["proj_w"] = jax.random.normal(
        keys[6], (expand_filters, oup), jnp.float32) * 0.1
    params["proj_bn"] = folded_bn(keys[7], oup)
    return params


# ----------------------------------------------------------------------------
# Pure-JAX reference (matches the PyTorch module, eval-mode BN)
# ----------------------------------------------------------------------------
def _ref_dw(x, w, stride, pad):
    K, _, C = w.shape
    return jax.lax.conv_general_dilated(
        x, w.reshape(K, K, 1, C), window_strides=(stride, stride),
        padding=[(pad, pad), (pad, pad)],
        dimension_numbers=("NHWC", "HWIO", "NHWC"),
        feature_group_count=C)


def uib_forward_ref(x_nchw, params, *, start_k, middle_k, middle_dw_downsample,
                    stride):
    x = jnp.transpose(x_nchw, (0, 2, 3, 1))
    if start_k:
        s = stride if not middle_dw_downsample else 1
        sc, sh = params["start_dw_bn"]
        x = _ref_dw(x, params["start_dw_w"], s, (start_k - 1) // 2) * sc[None] + sh[None]
    sc, sh = params["expand_bn"]
    x = jnp.einsum("nhwc,cd->nhwd", x, params["expand_w"]) * sc[None] + sh[None]
    x = jnp.clip(x, 0.0, 6.0)
    if middle_k:
        s = stride if middle_dw_downsample else 1
        sc, sh = params["middle_dw_bn"]
        x = _ref_dw(x, params["middle_dw_w"], s, (middle_k - 1) // 2) * sc[None] + sh[None]
        x = jnp.clip(x, 0.0, 6.0)
    sc, sh = params["proj_bn"]
    x = jnp.einsum("nhwc,cd->nhwd", x, params["proj_w"]) * sc[None] + sh[None]
    return jnp.transpose(x, (0, 3, 1, 2))


# ----------------------------------------------------------------------------
if __name__ == "__main__":
    # Block config (matches the PyTorch __init__ used here)
    inp, oup = 8, 16
    start_dw_kernel_size = 3
    middle_dw_kernel_size = 3
    middle_dw_downsample = True
    stride = 2
    expand_ratio = 4.0

    key = jax.random.PRNGKey(0)
    kx, kp = jax.random.split(key)
    x = jax.random.normal(kx, (2, inp, 16, 16), jnp.float32)   # NCHW (PyTorch)
    params = init_params(kp, inp, oup, start_dw_kernel_size,
                         middle_dw_kernel_size, expand_ratio)

    kwargs = dict(start_k=start_dw_kernel_size, middle_k=middle_dw_kernel_size,
                  middle_dw_downsample=middle_dw_downsample, stride=stride)

    ref = uib_forward_ref(x, params, **kwargs)

    # Exact-math check (f32 MXU path).
    out_f32 = jax.block_until_ready(
        uib_forward_pallas(x, params, pw_dtype=jnp.float32, **kwargs))
    assert out_f32.shape == (2, oup, 8, 8), out_f32.shape
    err_f32 = float(jnp.max(jnp.abs(out_f32 - ref)))
    assert jnp.allclose(out_f32, ref, atol=1e-3, rtol=1e-3), err_f32

    # bf16 pointwise-matmul path (production config; f32 accumulation on MXU).
    out_bf16 = jax.block_until_ready(
        uib_forward_pallas(x, params, pw_dtype=jnp.bfloat16, **kwargs))
    err_bf16 = float(jnp.max(jnp.abs(out_bf16 - ref)))
    assert jnp.allclose(out_bf16, ref, atol=2e-2, rtol=2e-2), err_bf16

    print("KERNEL_OK")
</pallas_src>

<mosaic_0001>
module attributes {stable_mosaic.version = 11 : i64} {
  func.func @kernel(%arg0: i32, %arg1: memref<1x16x16x8xf32, #tpu.memory_space<vmem>>, %arg2: memref<3x3x8xf32, #tpu.memory_space<vmem>>, %arg3: memref<1x8xf32, #tpu.memory_space<vmem>>, %arg4: memref<8x32xf32, #tpu.memory_space<vmem>>, %arg5: memref<1x32xf32, #tpu.memory_space<vmem>>, %arg6: memref<3x3x32xf32, #tpu.memory_space<vmem>>, %arg7: memref<1x32xf32, #tpu.memory_space<vmem>>, %arg8: memref<32x16xf32, #tpu.memory_space<vmem>>, %arg9: memref<1x16xf32, #tpu.memory_space<vmem>>, %arg10: memref<1x16x64xf32, #tpu.memory_space<vmem>>, %arg11: memref<18x18x8xf32, #tpu.memory_space<vmem>>, %arg12: memref<18x18x32xf32, #tpu.memory_space<vmem>>) attributes {dimension_semantics = [#tpu.dimension_semantics<parallel>], iteration_bounds = array<i64: 2>, scalar_prefetch = 0 : i64, scratch_operands = 2 : i64, tpu.core_type = #tpu.core_type<tc>, window_params = [{transform_indices = @transform_0, window_bounds = array<i64: 1, 16, 16, 8>}, {pipeline_mode = #tpu.pipeline_mode<synchronous>, transform_indices = @transform_1, window_bounds = array<i64: 3, 3, 8>}, {pipeline_mode = #tpu.pipeline_mode<synchronous>, transform_indices = @transform_2, window_bounds = array<i64: 1, 8>}, {pipeline_mode = #tpu.pipeline_mode<synchronous>, transform_indices = @transform_3, window_bounds = array<i64: 8, 32>}, {pipeline_mode = #tpu.pipeline_mode<synchronous>, transform_indices = @transform_4, window_bounds = array<i64: 1, 32>}, {pipeline_mode = #tpu.pipeline_mode<synchronous>, transform_indices = @transform_5, window_bounds = array<i64: 3, 3, 32>}, {pipeline_mode = #tpu.pipeline_mode<synchronous>, transform_indices = @transform_6, window_bounds = array<i64: 1, 32>}, {pipeline_mode = #tpu.pipeline_mode<synchronous>, transform_indices = @transform_7, window_bounds = array<i64: 32, 16>}, {pipeline_mode = #tpu.pipeline_mode<synchronous>, transform_indices = @transform_8, window_bounds = array<i64: 1, 16>}, {transform_indices = @transform_9, window_bounds = array<i64: 1, 16, 64>}]} {
    %c0 = arith.constant 0 : index
    %c0_0 = arith.constant 0 : index
    %c0_1 = arith.constant 0 : index
    %c0_2 = arith.constant 0 : index
    %0 = vector.load %arg1[%c0, %c0_0, %c0_1, %c0_2] : memref<1x16x16x8xf32, #tpu.memory_space<vmem>>, vector<1x16x16x8xf32>
    %1 = vector.shape_cast %0 : vector<1x16x16x8xf32> to vector<16x16x8xf32>
    %cst = arith.constant 0.000000e+00 : f32
    %2 = vector.broadcast %cst : f32 to vector<1x18x8xf32>
    %c0_3 = arith.constant 0 : index
    %c0_4 = arith.constant 0 : index
    %c0_5 = arith.constant 0 : index
    %3 = vector.load %arg11[%c0_3, %c0_4, %c0_5] : memref<18x18x8xf32, #tpu.memory_space<vmem>>, vector<1x18x8xf32>
    tpu.vector_store %arg11[%c0_3, %c0_4, %c0_5], %2 {strides = array<i32>} : memref<18x18x8xf32, #tpu.memory_space<vmem>>, vector<1x18x8xf32>,
    %c17 = arith.constant 17 : index
    %c0_6 = arith.constant 0 : index
    %c0_7 = arith.constant 0 : index
    %4 = vector.load %arg11[%c17, %c0_6, %c0_7] : memref<18x18x8xf32, #tpu.memory_space<vmem>>, vector<1x18x8xf32>
    tpu.vector_store %arg11[%c17, %c0_6, %c0_7], %2 {strides = array<i32>} : memref<18x18x8xf32, #tpu.memory_space<vmem>>, vector<1x18x8xf32>,
    %cst_8 = arith.constant 0.000000e+00 : f32
    %5 = vector.broadcast %cst_8 : f32 to vector<18x1x8xf32>
    %c0_9 = arith.constant 0 : index
    %c0_10 = arith.constant 0 : index
    %c0_11 = arith.constant 0 : index
    %6 = vector.load %arg11[%c0_9, %c0_10, %c0_11] : memref<18x18x8xf32, #tpu.memory_space<vmem>>, vector<18x1x8xf32>
    tpu.vector_store %arg11[%c0_9, %c0_10, %c0_11], %5 {strides = array<i32>} : memref<18x18x8xf32, #tpu.memory_space<vmem>>, vector<18x1x8xf32>,
    %c0_12 = arith.constant 0 : index
    %c17_13 = arith.constant 17 : index
    %c0_14 = arith.constant 0 : index
    %7 = vector.load %arg11[%c0_12, %c17_13, %c0_14] : memref<18x18x8xf32, #tpu.memory_space<vmem>>, vector<18x1x8xf32>
    tpu.vector_store %arg11[%c0_12, %c17_13, %c0_14], %5 {strides = array<i32>} : memref<18x18x8xf32, #tpu.memory_space<vmem>>, vector<18x1x8xf32>,
    %c1 = arith.constant 1 : index
    %c1_15 = arith.constant 1 : index
    %c0_16 = arith.constant 0 : index
    %8 = vector.load %arg11[%c1, %c1_15, %c0_16] : memref<18x18x8xf32, #tpu.memory_space<vmem>>, vector<16x16x8xf32>
    tpu.vector_store %arg11[%c1, %c1_15, %c0_16], %1 {strides = array<i32>} : memref<18x18x8xf32, #tpu.memory_space<vmem>>, vector<16x16x8xf32>,
    %c0_17 = arith.constant 0 : index
    %c0_18 = arith.constant 0 : index
    %c0_19 = arith.constant 0 : index
    %9 = vector.load %arg2[%c0_17, %c0_18, %c0_19] : memref<3x3x8xf32, #tpu.memory_space<vmem>>, vector<3x3x8xf32>
    %cst_20 = arith.constant 0.000000e+00 : f32
    %10 = vector.broadcast %cst_20 : f32 to vector<16x16x8xf32>
    %c0_21 = arith.constant 0 : index
    %c0_22 = arith.constant 0 : index
    %c0_23 = arith.constant 0 : index
    %11 = vector.load %arg11[%c0_21, %c0_22, %c0_23] : memref<18x18x8xf32, #tpu.memory_space<vmem>>, vector<16x16x8xf32>
    %12 = vector.extract_strided_slice %9 {offsets = [0, 0, 0], sizes = [1, 1, 8], strides = [1, 1, 1]} : vector<3x3x8xf32> to vector<1x1x8xf32>
    %13 = vector.shape_cast %12 : vector<1x1x8xf32> to vector<8xf32>
    %14 = vector.shape_cast %13 : vector<8xf32> to vector<1x1x8xf32>
    %15 = vector.broadcast %14 : vector<1x1x8xf32> to vector<16x16x8xf32>
    %16 = arith.mulf %11, %15 : vector<16x16x8xf32>
    %17 = arith.addf %10, %16 : vector<16x16x8xf32>
    %c0_24 = arith.constant 0 : index
    %c1_25 = arith.constant 1 : index
    %c0_26 = arith.constant 0 : index
    %18 = vector.load %arg11[%c0_24, %c1_25, %c0_26] : memref<18x18x8xf32, #tpu.memory_space<vmem>>, vector<16x16x8xf32>
    %19 = vector.extract_strided_slice %9 {offsets = [0, 1, 0], sizes = [1, 1, 8], strides = [1, 1, 1]} : vector<3x3x8xf32> to vector<1x1x8xf32>
    %20 = vector.shape_cast %19 : vector<1x1x8xf32> to vector<8xf32>
    %21 = vector.shape_cast %20 : vector<8xf32> to vector<1x1x8xf32>
    %22 = vector.broadcast %21 : vector<1x1x8xf32> to vector<16x16x8xf32>
    %23 = arith.mulf %18, %22 : vector<16x16x8xf32>
    %24 = arith.addf %17, %23 : vector<16x16x8xf32>
    %c0_27 = arith.constant 0 : index
    %c2 = arith.constant 2 : index
    %c0_28 = arith.constant 0 : index
    %25 = vector.load %arg11[%c0_27, %c2, %c0_28] : memref<18x18x8xf32, #tpu.memory_space<vmem>>, vector<16x16x8xf32>
    %26 = vector.extract_strided_slice %9 {offsets = [0, 2, 0], sizes = [1, 1, 8], strides = [1, 1, 1]} : vector<3x3x8xf32> to vector<1x1x8xf32>
    %27 = vector.shape_cast %26 : vector<1x1x8xf32> to vector<8xf32>
    %28 = vector.shape_cast %27 : vector<8xf32> to vector<1x1x8xf32>
    %29 = vector.broadcast %28 : vector<1x1x8xf32> to vector<16x16x8xf32>
    %30 = arith.mulf %25, %29 : vector<16x16x8xf32>
    %31 = arith.addf %24, %30 : vector<16x16x8xf32>
    %c1_29 = arith.constant 1 : index
    %c0_30 = arith.constant 0 : index
    %c0_31 = arith.constant 0 : index
    %32 = vector.load %arg11[%c1_29, %c0_30, %c0_31] : memref<18x18x8xf32, #tpu.memory_space<vmem>>, vector<16x16x8xf32>
    %33 = vector.extract_strided_slice %9 {offsets = [1, 0, 0], sizes = [1, 1, 8], strides = [1, 1, 1]} : vector<3x3x8xf32> to vector<1x1x8xf32>
    %34 = vector.shape_cast %33 : vector<1x1x8xf32> to vector<8xf32>
    %35 = vector.shape_cast %34 : vector<8xf32> to vector<1x1x8xf32>
    %36 = vector.broadcast %35 : vector<1x1x8xf32> to vector<16x16x8xf32>
    %37 = arith.mulf %32, %36 : vector<16x16x8xf32>
    %38 = arith.addf %31, %37 : vector<16x16x8xf32>
    %c1_32 = arith.constant 1 : index
    %c1_33 = arith.constant 1 : index
    %c0_34 = arith.constant 0 : index
    %39 = vector.load %arg11[%c1_32, %c1_33, %c0_34] : memref<18x18x8xf32, #tpu.memory_space<vmem>>, vector<16x16x8xf32>
    %40 = vector.extract_strided_slice %9 {offsets = [1, 1, 0], sizes = [1, 1, 8], strides = [1, 1, 1]} : vector<3x3x8xf32> to vector<1x1x8xf32>
    %41 = vector.shape_cast %40 : vector<1x1x8xf32> to vector<8xf32>
    %42 = vector.shape_cast %41 : vector<8xf32> to vector<1x1x8xf32>
    %43 = vector.broadcast %42 : vector<1x1x8xf32> to vector<16x16x8xf32>
    %44 = arith.mulf %39, %43 : vector<16x16x8xf32>
    %45 = arith.addf %38, %44 : vector<16x16x8xf32>
    %c1_35 = arith.constant 1 : index
    %c2_36 = arith.constant 2 : index
    %c0_37 = arith.constant 0 : index
    %46 = vector.load %arg11[%c1_35, %c2_36, %c0_37] : memref<18x18x8xf32, #tpu.memory_space<vmem>>, vector<16x16x8xf32>
    %47 = vector.extract_strided_slice %9 {offsets = [1, 2, 0], sizes = [1, 1, 8], strides = [1, 1, 1]} : vector<3x3x8xf32> to vector<1x1x8xf32>
    %48 = vector.shape_cast %47 : vector<1x1x8xf32> to vector<8xf32>
    %49 = vector.shape_cast %48 : vector<8xf32> to vector<1x1x8xf32>
    %50 = vector.broadcast %49 : vector<1x1x8xf32> to vector<16x16x8xf32>
    %51 = arith.mulf %46, %50 : vector<16x16x8xf32>
    %52 = arith.addf %45, %51 : vector<16x16x8xf32>
    %c2_38 = arith.constant 2 : index
    %c0_39 = arith.constant 0 : index
    %c0_40 = arith.constant 0 : index
    %53 = vector.load %arg11[%c2_38, %c0_39, %c0_40] : memref<18x18x8xf32, #tpu.memory_space<vmem>>, vector<16x16x8xf32>
    %54 = vector.extract_strided_slice %9 {offsets = [2, 0, 0], sizes = [1, 1, 8], strides = [1, 1, 1]} : vector<3x3x8xf32> to vector<1x1x8xf32>
    %55 = vector.shape_cast %54 : vector<1x1x8xf32> to vector<8xf32>
    %56 = vector.shape_cast %55 : vector<8xf32> to vector<1x1x8xf32>
    %57 = vector.broadcast %56 : vector<1x1x8xf32> to vector<16x16x8xf32>
    %58 = arith.mulf %53, %57 : vector<16x16x8xf32>
    %59 = arith.addf %52, %58 : vector<16x16x8xf32>
    %c2_41 = arith.constant 2 : index
    %c1_42 = arith.constant 1 : index
    %c0_43 = arith.constant 0 : index
    %60 = vector.load %arg11[%c2_41, %c1_42, %c0_43] : memref<18x18x8xf32, #tpu.memory_space<vmem>>, vector<16x16x8xf32>
    %61 = vector.extract_strided_slice %9 {offsets = [2, 1, 0], sizes = [1, 1, 8], strides = [1, 1, 1]} : vector<3x3x8xf32> to vector<1x1x8xf32>
    %62 = vector.shape_cast %61 : vector<1x1x8xf32> to vector<8xf32>
    %63 = vector.shape_cast %62 : vector<8xf32> to vector<1x1x8xf32>
    %64 = vector.broadcast %63 : vector<1x1x8xf32> to vector<16x16x8xf32>
    %65 = arith.mulf %60, %64 : vector<16x16x8xf32>
    %66 = arith.addf %59, %65 : vector<16x16x8xf32>
    %c2_44 = arith.constant 2 : index
    %c2_45 = arith.constant 2 : index
    %c0_46 = arith.constant 0 : index
    %67 = vector.load %arg11[%c2_44, %c2_45, %c0_46] : memref<18x18x8xf32, #tpu.memory_space<vmem>>, vector<16x16x8xf32>
    %68 = vector.extract_strided_slice %9 {offsets = [2, 2, 0], sizes = [1, 1, 8], strides = [1, 1, 1]} : vector<3x3x8xf32> to vector<1x1x8xf32>
    %69 = vector.shape_cast %68 : vector<1x1x8xf32> to vector<8xf32>
    %70 = vector.shape_cast %69 : vector<8xf32> to vector<1x1x8xf32>
    %71 = vector.broadcast %70 : vector<1x1x8xf32> to vector<16x16x8xf32>
    %72 = arith.mulf %67, %71 : vector<16x16x8xf32>
    %73 = arith.addf %66, %72 : vector<16x16x8xf32>
    %c0_47 = arith.constant 0 : index
    %c0_48 = arith.constant 0 : index
    %74 = vector.load %arg3[%c0_47, %c0_48] : memref<1x8xf32, #tpu.memory_space<vmem>>, vector<1x8xf32>
    %75 = vector.shape_cast %74 : vector<1x8xf32> to vector<8xf32>
    %76 = vector.shape_cast %75 : vector<8xf32> to vector<1x1x8xf32>
    %77 = vector.broadcast %76 : vector<1x1x8xf32> to vector<16x16x8xf32>
    %78 = arith.addf %73, %77 : vector<16x16x8xf32>
    %79 = vector.shape_cast %78 : vector<16x16x8xf32> to vector<256x8xf32>
    %c0_49 = arith.constant 0 : index
    %c0_50 = arith.constant 0 : index
    %80 = vector.load %arg4[%c0_49, %c0_50] : memref<8x32xf32, #tpu.memory_space<vmem>>, vector<8x32xf32>
    %cst_51 = arith.constant dense<0.000000e+00> : vector<256x32xf32>
    %81 = tpu.matmul %79, %80, %cst_51 {dimension_numbers = #tpu.dot_dimension_numbers<[1], [0], [0], [1], [0, 0, 1, 1], [], []>} : vector<256x8xf32>, vector<8x32xf32>, vector<256x32xf32> -> vector<256x32xf32>
    %c0_52 = arith.constant 0 : index
    %c0_53 = arith.constant 0 : index
    %82 = vector.load %arg5[%c0_52, %c0_53] : memref<1x32xf32, #tpu.memory_space<vmem>>, vector<1x32xf32>
    %83 = vector.broadcast %82 : vector<1x32xf32> to vector<256x32xf32>
    %84 = arith.addf %81, %83 : vector<256x32xf32>
    %cst_54 = arith.constant 0.000000e+00 : f32
    %cst_55 = arith.constant 6.000000e+00 : f32
    %85 = vector.broadcast %cst_54 : f32 to vector<256x32xf32>
    %86 = arith.maximumf %85, %84 : vector<256x32xf32>
    %87 = vector.broadcast %cst_55 : f32 to vector<256x32xf32>
    %88 = arith.minimumf %87, %86 : vector<256x32xf32>
    %cst_56 = arith.constant 0.000000e+00 : f32
    %89 = vector.broadcast %cst_56 : f32 to vector<1x18x32xf32>
    %c0_57 = arith.constant 0 : index
    %c0_58 = arith.constant 0 : index
    %c0_59 = arith.constant 0 : index
    %90 = vector.load %arg12[%c0_57, %c0_58, %c0_59] : memref<18x18x32xf32, #tpu.memory_space<vmem>>, vector<1x18x32xf32>
    tpu.vector_store %arg12[%c0_57, %c0_58, %c0_59], %89 {strides = array<i32>} : memref<18x18x32xf32, #tpu.memory_space<vmem>>, vector<1x18x32xf32>,
    %c17_60 = arith.constant 17 : index
    %c0_61 = arith.constant 0 : index
    %c0_62 = arith.constant 0 : index
    %91 = vector.load %arg12[%c17_60, %c0_61, %c0_62] : memref<18x18x32xf32, #tpu.memory_space<vmem>>, vector<1x18x32xf32>
    tpu.vector_store %arg12[%c17_60, %c0_61, %c0_62], %89 {strides = array<i32>} : memref<18x18x32xf32, #tpu.memory_space<vmem>>, vector<1x18x32xf32>,
    %cst_63 = arith.constant 0.000000e+00 : f32
    %92 = vector.broadcast %cst_63 : f32 to vector<18x1x32xf32>
    %c0_64 = arith.constant 0 : index
    %c0_65 = arith.constant 0 : index
    %c0_66 = arith.constant 0 : index
    %93 = vector.load %arg12[%c0_64, %c0_65, %c0_66] : memref<18x18x32xf32, #tpu.memory_space<vmem>>, vector<18x1x32xf32>
    tpu.vector_store %arg12[%c0_64, %c0_65, %c0_66], %92 {strides = array<i32>} : memref<18x18x32xf32, #tpu.memory_space<vmem>>, vector<18x1x32xf32>,
    %c0_67 = arith.constant 0 : index
    %c17_68 = arith.constant 17 : index
    %c0_69 = arith.constant 0 : index
    %94 = vector.load %arg12[%c0_67, %c17_68, %c0_69] : memref<18x18x32xf32, #tpu.memory_space<vmem>>, vector<18x1x32xf32>
    tpu.vector_store %arg12[%c0_67, %c17_68, %c0_69], %92 {strides = array<i32>} : memref<18x18x32xf32, #tpu.memory_space<vmem>>, vector<18x1x32xf32>,
    %95 = vector.shape_cast %88 : vector<256x32xf32> to vector<16x16x32xf32>
    %c1_70 = arith.constant 1 : index
    %c1_71 = arith.constant 1 : index
    %c0_72 = arith.constant 0 : index
    %96 = vector.load %arg12[%c1_70, %c1_71, %c0_72] : memref<18x18x32xf32, #tpu.memory_space<vmem>>, vector<16x16x32xf32>
    tpu.vector_store %arg12[%c1_70, %c1_71, %c0_72], %95 {strides = array<i32>} : memref<18x18x32xf32, #tpu.memory_space<vmem>>, vector<16x16x32xf32>,
    %c0_73 = arith.constant 0 : index
    %c0_74 = arith.constant 0 : index
    %c0_75 = arith.constant 0 : index
    %97 = vector.load %arg6[%c0_73, %c0_74, %c0_75] : memref<3x3x32xf32, #tpu.memory_space<vmem>>, vector<3x3x32xf32>
    %cst_76 = arith.constant 0.000000e+00 : f32
    %98 = vector.broadcast %cst_76 : f32 to vector<8x8x32xf32>
    %c0_77 = arith.constant 0 : index
    %c0_78 = arith.constant 0 : index
    %c0_79 = arith.constant 0 : index
    %99 = tpu.strided_load %arg12[%c0_77, %c0_78, %c0_79] {strides = array<i32: 2, 2, 1>} : memref<18x18x32xf32, #tpu.memory_space<vmem>>, vector<8x8x32xf32>
    %100 = vector.extract_strided_slice %97 {offsets = [0, 0, 0], sizes = [1, 1, 32], strides = [1, 1, 1]} : vector<3x3x32xf32> to vector<1x1x32xf32>
    %101 = vector.shape_cast %100 : vector<1x1x32xf32> to vector<32xf32>
    %102 = vector.shape_cast %101 : vector<32xf32> to vector<1x1x32xf32>
    %103 = vector.broadcast %102 : vector<1x1x32xf32> to vector<8x8x32xf32>
    %104 = arith.mulf %99, %103 : vector<8x8x32xf32>
    %105 = arith.addf %98, %104 : vector<8x8x32xf32>
    %c0_80 = arith.constant 0 : index
    %c1_81 = arith.constant 1 : index
    %c0_82 = arith.constant 0 : index
    %106 = tpu.strided_load %arg12[%c0_80, %c1_81, %c0_82] {strides = array<i32: 2, 2, 1>} : memref<18x18x32xf32, #tpu.memory_space<vmem>>, vector<8x8x32xf32>
    %107 = vector.extract_strided_slice %97 {offsets = [0, 1, 0], sizes = [1, 1, 32], strides = [1, 1, 1]} : vector<3x3x32xf32> to vector<1x1x32xf32>
    %108 = vector.shape_cast %107 : vector<1x1x32xf32> to vector<32xf32>
    %109 = vector.shape_cast %108 : vector<32xf32> to vector<1x1x32xf32>
    %110 = vector.broadcast %109 : vector<1x1x32xf32> to vector<8x8x32xf32>
    %111 = arith.mulf %106, %110 : vector<8x8x32xf32>
    %112 = arith.addf %105, %111 : vector<8x8x32xf32>
    %c0_83 = arith.constant 0 : index
    %c2_84 = arith.constant 2 : index
    %c0_85 = arith.constant 0 : index
    %113 = tpu.strided_load %arg12[%c0_83, %c2_84, %c0_85] {strides = array<i32: 2, 2, 1>} : memref<18x18x32xf32, #tpu.memory_space<vmem>>, vector<8x8x32xf32>
    %114 = vector.extract_strided_slice %97 {offsets = [0, 2, 0], sizes = [1, 1, 32], strides = [1, 1, 1]} : vector<3x3x32xf32> to vector<1x1x32xf32>
    %115 = vector.shape_cast %114 : vector<1x1x32xf32> to vector<32xf32>
    %116 = vector.shape_cast %115 : vector<32xf32> to vector<1x1x32xf32>
    %117 = vector.broadcast %116 : vector<1x1x32xf32> to vector<8x8x32xf32>
    %118 = arith.mulf %113, %117 : vector<8x8x32xf32>
    %119 = arith.addf %112, %118 : vector<8x8x32xf32>
    %c1_86 = arith.constant 1 : index
    %c0_87 = arith.constant 0 : index
    %c0_88 = arith.constant 0 : index
    %120 = tpu.strided_load %arg12[%c1_86, %c0_87, %c0_88] {strides = array<i32: 2, 2, 1>} : memref<18x18x32xf32, #tpu.memory_space<vmem>>, vector<8x8x32xf32>
    %121 = vector.extract_strided_slice %97 {offsets = [1, 0, 0], sizes = [1, 1, 32], strides = [1, 1, 1]} : vector<3x3x32xf32> to vector<1x1x32xf32>
    %122 = vector.shape_cast %121 : vector<1x1x32xf32> to vector<32xf32>
    %123 = vector.shape_cast %122 : vector<32xf32> to vector<1x1x32xf32>
    %124 = vector.broadcast %123 : vector<1x1x32xf32> to vector<8x8x32xf32>
    %125 = arith.mulf %120, %124 : vector<8x8x32xf32>
    %126 = arith.addf %119, %125 : vector<8x8x32xf32>
    %c1_89 = arith.constant 1 : index
    %c1_90 = arith.constant 1 : index
    %c0_91 = arith.constant 0 : index
    %127 = tpu.strided_load %arg12[%c1_89, %c1_90, %c0_91] {strides = array<i32: 2, 2, 1>} : memref<18x18x32xf32, #tpu.memory_space<vmem>>, vector<8x8x32xf32>
    %128 = vector.extract_strided_slice %97 {offsets = [1, 1, 0], sizes = [1, 1, 32], strides = [1, 1, 1]} : vector<3x3x32xf32> to vector<1x1x32xf32>
    %129 = vector.shape_cast %128 : vector<1x1x32xf32> to vector<32xf32>
    %130 = vector.shape_cast %129 : vector<32xf32> to vector<1x1x32xf32>
    %131 = vector.broadcast %130 : vector<1x1x32xf32> to vector<8x8x32xf32>
    %132 = arith.mulf %127, %131 : vector<8x8x32xf32>
    %133 = arith.addf %126, %132 : vector<8x8x32xf32>
    %c1_92 = arith.constant 1 : index
    %c2_93 = arith.constant 2 : index
    %c0_94 = arith.constant 0 : index
    %134 = tpu.strided_load %arg12[%c1_92, %c2_93, %c0_94] {strides = array<i32: 2, 2, 1>} : memref<18x18x32xf32, #tpu.memory_space<vmem>>, vector<8x8x32xf32>
    %135 = vector.extract_strided_slice %97 {offsets = [1, 2, 0], sizes = [1, 1, 32], strides = [1, 1, 1]} : vector<3x3x32xf32> to vector<1x1x32xf32>
    %136 = vector.shape_cast %135 : vector<1x1x32xf32> to vector<32xf32>
    %137 = vector.shape_cast %136 : vector<32xf32> to vector<1x1x32xf32>
    %138 = vector.broadcast %137 : vector<1x1x32xf32> to vector<8x8x32xf32>
    %139 = arith.mulf %134, %138 : vector<8x8x32xf32>
    %140 = arith.addf %133, %139 : vector<8x8x32xf32>
    %c2_95 = arith.constant 2 : index
    %c0_96 = arith.constant 0 : index
    %c0_97 = arith.constant 0 : index
    %141 = tpu.strided_load %arg12[%c2_95, %c0_96, %c0_97] {strides = array<i32: 2, 2, 1>} : memref<18x18x32xf32, #tpu.memory_space<vmem>>, vector<8x8x32xf32>
    %142 = vector.extract_strided_slice %97 {offsets = [2, 0, 0], sizes = [1, 1, 32], strides = [1, 1, 1]} : vector<3x3x32xf32> to vector<1x1x32xf32>
    %143 = vector.shape_cast %142 : vector<1x1x32xf32> to vector<32xf32>
    %144 = vector.shape_cast %143 : vector<32xf32> to vector<1x1x32xf32>
    %145 = vector.broadcast %144 : vector<1x1x32xf32> to vector<8x8x32xf32>
    %146 = arith.mulf %141, %145 : vector<8x8x32xf32>
    %147 = arith.addf %140, %146 : vector<8x8x32xf32>
    %c2_98 = arith.constant 2 : index
    %c1_99 = arith.constant 1 : index
    %c0_100 = arith.constant 0 : index
    %148 = tpu.strided_load %arg12[%c2_98, %c1_99, %c0_100] {strides = array<i32: 2, 2, 1>} : memref<18x18x32xf32, #tpu.memory_space<vmem>>, vector<8x8x32xf32>
    %149 = vector.extract_strided_slice %97 {offsets = [2, 1, 0], sizes = [1, 1, 32], strides = [1, 1, 1]} : vector<3x3x32xf32> to vector<1x1x32xf32>
    %150 = vector.shape_cast %149 : vector<1x1x32xf32> to vector<32xf32>
    %151 = vector.shape_cast %150 : vector<32xf32> to vector<1x1x32xf32>
    %152 = vector.broadcast %151 : vector<1x1x32xf32> to vector<8x8x32xf32>
    %153 = arith.mulf %148, %152 : vector<8x8x32xf32>
    %154 = arith.addf %147, %153 : vector<8x8x32xf32>
    %c2_101 = arith.constant 2 : index
    %c2_102 = arith.constant 2 : index
    %c0_103 = arith.constant 0 : index
    %155 = tpu.strided_load %arg12[%c2_101, %c2_102, %c0_103] {strides = array<i32: 2, 2, 1>} : memref<18x18x32xf32, #tpu.memory_space<vmem>>, vector<8x8x32xf32>
    %156 = vector.extract_strided_slice %97 {offsets = [2, 2, 0], sizes = [1, 1, 32], strides = [1, 1, 1]} : vector<3x3x32xf32> to vector<1x1x32xf32>
    %157 = vector.shape_cast %156 : vector<1x1x32xf32> to vector<32xf32>
    %158 = vector.shape_cast %157 : vector<32xf32> to vector<1x1x32xf32>
    %159 = vector.broadcast %158 : vector<1x1x32xf32> to vector<8x8x32xf32>
    %160 = arith.mulf %155, %159 : vector<8x8x32xf32>
    %161 = arith.addf %154, %160 : vector<8x8x32xf32>
    %c0_104 = arith.constant 0 : index
    %c0_105 = arith.constant 0 : index
    %162 = vector.load %arg7[%c0_104, %c0_105] : memref<1x32xf32, #tpu.memory_space<vmem>>, vector<1x32xf32>
    %163 = vector.shape_cast %162 : vector<1x32xf32> to vector<32xf32>
    %164 = vector.shape_cast %163 : vector<32xf32> to vector<1x1x32xf32>
    %165 = vector.broadcast %164 : vector<1x1x32xf32> to vector<8x8x32xf32>
    %166 = arith.addf %161, %165 : vector<8x8x32xf32>
    %cst_106 = arith.constant 0.000000e+00 : f32
    %cst_107 = arith.constant 6.000000e+00 : f32
    %167 = vector.broadcast %cst_106 : f32 to vector<8x8x32xf32>
    %168 = arith.maximumf %167, %166 : vector<8x8x32xf32>
    %169 = vector.broadcast %cst_107 : f32 to vector<8x8x32xf32>
    %170 = arith.minimumf %169, %168 : vector<8x8x32xf32>
    %171 = vector.shape_cast %170 : vector<8x8x32xf32> to vector<64x32xf32>
    %c0_108 = arith.constant 0 : index
    %c0_109 = arith.constant 0 : index
    %172 = vector.load %arg8[%c0_108, %c0_109] : memref<32x16xf32, #tpu.memory_space<vmem>>, vector<32x16xf32>
    %cst_110 = arith.constant dense<0.000000e+00> : vector<64x16xf32>
    %173 = tpu.matmul %171, %172, %cst_110 {dimension_numbers = #tpu.dot_dimension_numbers<[1], [0], [0], [1], [0, 0, 1, 1], [], []>} : vector<64x32xf32>, vector<32x16xf32>, vector<64x16xf32> -> vector<64x16xf32>
    %c0_111 = arith.constant 0 : index
    %c0_112 = arith.constant 0 : index
    %174 = vector.load %arg9[%c0_111, %c0_112] : memref<1x16xf32, #tpu.memory_space<vmem>>, vector<1x16xf32>
    %175 = vector.broadcast %174 : vector<1x16xf32> to vector<64x16xf32>
    %176 = arith.addf %173, %175 : vector<64x16xf32>
    %177 = tpu.transpose %176, [1, 0] : vector<64x16xf32> -> vector<16x64xf32>
    %c0_113 = arith.constant 0 : index
    %c0_114 = arith.constant 0 : index
    %c0_115 = arith.constant 0 : index
    %178 = vector.load %arg10[%c0_113, %c0_114, %c0_115] : memref<1x16x64xf32, #tpu.memory_space<vmem>>, vector<1x16x64xf32>
    %179 = vector.shape_cast %178 : vector<1x16x64xf32> to vector<16x64xf32>
    %180 = vector.shape_cast %177 : vector<16x64xf32> to vector<1x16x64xf32>
    tpu.vector_store %arg10[%c0_113, %c0_114, %c0_115], %180 {strides = array<i32>} : memref<1x16x64xf32, #tpu.memory_space<vmem>>, vector<1x16x64xf32>,
    return
  }
  func.func @transform_0(%arg0: i32) -> (i32, i32, i32, i32) {
    %c0_i32 = arith.constant 0 : i32
    %c0_i32_0 = arith.constant 0 : i32
    %c0_i32_1 = arith.constant 0 : i32
    %c0_i32_2 = arith.constant 0 : i32
    return %arg0, %c0_i32, %c0_i32_0, %c0_i32_1 : i32, i32, i32, i32
  }
  func.func @transform_1(%arg0: i32) -> (i32, i32, i32) {
    %c0_i32 = arith.constant 0 : i32
    %c0_i32_0 = arith.constant 0 : i32
    %c0_i32_1 = arith.constant 0 : i32
    %c0_i32_2 = arith.constant 0 : i32
    return %c0_i32, %c0_i32_0, %c0_i32_1 : i32, i32, i32
  }
  func.func @transform_2(%arg0: i32) -> (i32, i32) {
    %c0_i32 = arith.constant 0 : i32
    %c0_i32_0 = arith.constant 0 : i32
    %c0_i32_1 = arith.constant 0 : i32
    return %c0_i32, %c0_i32_0 : i32, i32
  }
  func.func @transform_3(%arg0: i32) -> (i32, i32) {
    %c0_i32 = arith.constant 0 : i32
    %c0_i32_0 = arith.constant 0 : i32
    %c0_i32_1 = arith.constant 0 : i32
    return %c0_i32, %c0_i32_0 : i32, i32
  }
  func.func @transform_4(%arg0: i32) -> (i32, i32) {
    %c0_i32 = arith.constant 0 : i32
    %c0_i32_0 = arith.constant 0 : i32
    %c0_i32_1 = arith.constant 0 : i32
    return %c0_i32, %c0_i32_0 : i32, i32
  }
  func.func @transform_5(%arg0: i32) -> (i32, i32, i32) {
    %c0_i32 = arith.constant 0 : i32
    %c0_i32_0 = arith.constant 0 : i32
    %c0_i32_1 = arith.constant 0 : i32
    %c0_i32_2 = arith.constant 0 : i32
    return %c0_i32, %c0_i32_0, %c0_i32_1 : i32, i32, i32
  }
  func.func @transform_6(%arg0: i32) -> (i32, i32) {
    %c0_i32 = arith.constant 0 : i32
    %c0_i32_0 = arith.constant 0 : i32
    %c0_i32_1 = arith.constant 0 : i32
    return %c0_i32, %c0_i32_0 : i32, i32
  }
  func.func @transform_7(%arg0: i32) -> (i32, i32) {
    %c0_i32 = arith.constant 0 : i32
    %c0_i32_0 = arith.constant 0 : i32
    %c0_i32_1 = arith.constant 0 : i32
    return %c0_i32, %c0_i32_0 : i32, i32
  }
  func.func @transform_8(%arg0: i32) -> (i32, i32) {
    %c0_i32 = arith.constant 0 : i32
    %c0_i32_0 = arith.constant 0 : i32
    %c0_i32_1 = arith.constant 0 : i32
    return %c0_i32, %c0_i32_0 : i32, i32
  }
  func.func @transform_9(%arg0: i32) -> (i32, i32, i32) {
    %c0_i32 = arith.constant 0 : i32
    %c0_i32_0 = arith.constant 0 : i32
    %c0_i32_1 = arith.constant 0 : i32
    return %arg0, %c0_i32, %c0_i32_0 : i32, i32, i32
  }
}

</mosaic_0001>

<bundles_post_ra>
// kernel: uib_forward_pallas.1
= control target key start
LH: loop header
LB: loop body
LE: loop exit
PB: predicated region body
PF: predicated region fallthrough
CT: control target
= control target key end

     0   :  { %s2742_s30 = smov 0   ;;  %s3865_s0 = inlined_call_operand.vmem [shape: f32[2,16,16,8], index: 0, kind: input, shape index: {}]   ;;  %s3866_s1 = inlined_call_operand.vmem [shape: f32[3,3,8], index: 1, kind: input, shape index: {}]   ;;  %s3867_s2 = inlined_call_operand.vmem [shape: f32[1,8], index: 2, kind: input, shape index: {}]   ;;  %s3868_s3 = inlined_call_operand.vmem [shape: f32[8,32], index: 3, kind: input, shape index: {}]   ;;  %s3869_s4 = inlined_call_operand.vmem [shape: f32[1,32], index: 4, kind: input, shape index: {}]   ;;  %s3870_s5 = inlined_call_operand.vmem [shape: f32[3,3,32], index: 5, kind: input, shape index: {}]   ;;  %s3871_s6 = inlined_call_operand.vmem [shape: f32[1,32], index: 6, kind: input, shape index: {}]   ;;  %s3872_s7 = inlined_call_operand.vmem [shape: f32[32,16], index: 7, kind: input, shape index: {}]   ;;  %s3873_s8 = inlined_call_operand.vmem [shape: f32[1,16], index: 8, kind: input, shape index: {}]   ;;  %s3874_s9 = inlined_call_operand.vmem [shape: f32[2,16,64], index: 9, kind: output, shape index: {}]  }
   0x1 LB: > { %s2491_s10 = sadd.s32 4294967295, %s2689_s30   ;;  %p2495_p0 = scmp.ge.s32.totalorder %s2689_s30, 1  ;;  %s2689_s30 = sphi %s2742_s30, %s19_s30  }
   0x2   : > { %p287_p1 = scmp.lt.s32.totalorder %s2689_s30, 3 }
   0x4   : > { %p288_p2 = pnand %p2495_p0, %p287_p1 }
   0x6   : > { %291 = sbr.rel (%p288_p2) target bundleno = 763 (0x2fb), region = 56 }
   0xd   : > { %v1387_v0 = vld [vmem:[%s3868_s3] sm:$0xff]  ;;  %p2755_p3 = scmp.lt.s32.totalorder %s2491_s10, 1  ;;  %vm365_vm0 = vcmask 64512   ;;  %vm374_vm1 = vcmask 57344   ;;  %v479_v1 = vlaneseq  ;;  %v3875_v2 = vmov 0.0  }
   0xe   : > { %2593 = vmatprep.subr.mxu0 %v1387_v0  ;;  %366 = vst.msk [vmem:[#allocation2] sm:$0xff] %vm365_vm0, %v3875_v2  ;;  %367 = vst.msk [vmem:[#allocation2 + $0x8] sm:$0xff] %vm365_vm0, %v3875_v2  ;;  %2671 = vmatprep.subr.mxu1 %v1387_v0  ;;  %vm368_vm2 = vcmask 58368   ;;  %v444_v4 = vld [vmem:[%s3866_s1] sm:$0x7]  ;;  %vm1780_vm3 = vcmask 261120  }
   0xf   : > { %376 = vst.msk [vmem:[#allocation2 + $0x18] sm:$0x1] %vm374_vm1, %v3875_v2  ;;  %377 = vst.msk [vmem:[#allocation2 + $0x30] sm:$0x1] %vm374_vm1, %v3875_v2  ;;  %2594 = vmatpush3.msra.mxu0 %v1387_v0  ;;  %s3888_s10 = smov (!%p2755_p3, %s2491_s10), 1  ;;  %v480_v3 = vshrl.u32 %v479_v1, 7  ;;  %2672 = vmatpush3.msra.mxu1 %v1387_v0 }
  0x10   : > { %371 = vst.msk [vmem:[#allocation2 + $0x198] sm:$0xff] %vm365_vm0, %v3875_v2  ;;  %372 = vst.msk [vmem:[#allocation2 + $0x1a0] sm:$0xff] %vm365_vm0, %v3875_v2  ;;  %s2546_s16 = sshll.u32 %s3888_s10, 8  ;;  %v445_v11 = vld [vmem:[%s3866_s1 + $0x4] sm:$0x7]  ;;  %vm1789_vm4 = vcmask 253952  }
  0x11   : > { %378 = vst.msk [vmem:[#allocation2 + $0x48] sm:$0x1] %vm374_vm1, %v3875_v2  ;;  %379 = vst.msk [vmem:[#allocation2 + $0x60] sm:$0x1] %vm374_vm1, %v3875_v2  ;;  %v2847_v5 = vsub.s32 0, %v480_v3  ;;  %v2849_v6 = vsub.s32 1, %v480_v3  ;;  %s2860_s19 = scalar_lea.vmem %s3865_s0, %s2546_s16 }
  0x12   : > { %380 = vst.msk [vmem:[#allocation2 + $0x78] sm:$0x1] %vm374_vm1, %v3875_v2  ;;  %381 = vst.msk [vmem:[#allocation2 + $0x90] sm:$0x1] %vm374_vm1, %v3875_v2  ;;  %v2851_v7 = vsub.s32 2, %v480_v3  ;;  %v333_v8 = vld [vmem:[%s2860_s19] sm:$0xff] }
  0x13   : > { %382 = vst.msk [vmem:[#allocation2 + $0xa8] sm:$0x1] %vm374_vm1, %v3875_v2  ;;  %383 = vst.msk [vmem:[#allocation2 + $0xc0] sm:$0x1] %vm374_vm1, %v3875_v2  ;;  %v334_v9 = vld [vmem:[%s2860_s19 + $0x8] sm:$0xff]  ;;  %v335_v10 = vld [vmem:[%s2860_s19 + $0x10] sm:$0xff]  ;;  %v2869_v12 = vrot.slane %v444_v4, %v2847_v5  ;;  %v2872_v13 = vrot.slane %v444_v4, %v2849_v6  ;;  %v2900_v32 = vrot.slane %v445_v11, %v2847_v5 }
  0x14   : > { %384 = vst.msk [vmem:[#allocation2 + $0xd8] sm:$0x1] %vm374_vm1, %v3875_v2  ;;  %385 = vst.msk [vmem:[#allocation2 + $0xf0] sm:$0x1] %vm374_vm1, %v3875_v2  ;;  %v2875_v14 = vrot.slane %v444_v4, %v2851_v7  ;;  %v336_v15 = vld [vmem:[%s2860_s19 + $0x18] sm:$0xff]  ;;  %v337_v16 = vld [vmem:[%s2860_s19 + $0x20] sm:$0xff]  ;;  %v2903_v33 = vrot.slane %v445_v11, %v2849_v6  ;;  %v2917_v43 = vrot.slane %v445_v11, %v2851_v7 }
  0x15   : > { %386 = vst.msk [vmem:[#allocation2 + $0x108] sm:$0x1] %vm374_vm1, %v3875_v2  ;;  %387 = vst.msk [vmem:[#allocation2 + $0x120] sm:$0x1] %vm374_vm1, %v3875_v2  ;;  %v338_v17 = vld [vmem:[%s2860_s19 + $0x28] sm:$0xff]  ;;  %v339_v25 = vld [vmem:[%s2860_s19 + $0x30] sm:$0xff] }
  0x16   : > { %388 = vst.msk [vmem:[#allocation2 + $0x138] sm:$0x1] %vm374_vm1, %v3875_v2  ;;  %389 = vst.msk [vmem:[#allocation2 + $0x150] sm:$0x1] %vm374_vm1, %v3875_v2  ;;  %v547_v18 = vld [vmem:[#allocation2 + $0x1] sm:$0xff]  ;;  %v340_v26 = vld [vmem:[%s2860_s19 + $0x38] sm:$0xff] }
  0x17   : > { %390 = vst.msk [vmem:[#allocation2 + $0x168] sm:$0x1] %vm374_vm1, %v3875_v2  ;;  %391 = vst.msk [vmem:[#allocation2 + $0x180] sm:$0x1] %vm374_vm1, %v3875_v2  ;;  %v647_v19 = vld [vmem:[#allocation2 + $0x2] sm:$0xff]  ;;  %v583_v23 = vmul.f32 %v2872_v13, %v547_v18  ;;  %v343_v36 = vld [vmem:[%s2860_s19 + $0x50] sm:$0xff] }
  0x18   : > { %394 = vst.msk [vmem:[#allocation2 + $0x29] sm:$0x1] %vm374_vm1, %v3875_v2  ;;  %395 = vst.msk [vmem:[#allocation2 + $0x41] sm:$0x1] %vm374_vm1, %v3875_v2  ;;  %v448_v20 = vld [vmem:[#allocation2 + $0x8] sm:$0xff]  ;;  %v683_v28 = vmul.f32 %v2875_v14, %v647_v19  ;;  %v341_v30 = vld [vmem:[%s2860_s19 + $0x40] sm:$0xff] }
  0x19   : > { %396 = vst.msk [vmem:[#allocation2 + $0x59] sm:$0x1] %vm374_vm1, %v3875_v2  ;;  %397 = vst.msk [vmem:[#allocation2 + $0x71] sm:$0x1] %vm374_vm1, %v3875_v2  ;;  %v446_v21 = vld [vmem:[%s3866_s1 + $0x8] sm:$0x7]  ;;  %v484_v24 = vmul.f32 %v2869_v12, %v448_v20 }
  0x1a   : > { %398 = vst.msk [vmem:[#allocation2 + $0x89] sm:$0x1] %vm374_vm1, %v3875_v2  ;;  %399 = vst.msk [vmem:[#allocation2 + $0xa1] sm:$0x1] %vm374_vm1, %v3875_v2  ;;  %v342_v31 = vld [vmem:[%s2860_s19 + $0x48] sm:$0xff]  ;;  %v344_v37 = vld [vmem:[%s2860_s19 + $0x58] sm:$0xff]  ;;  %v2926_v51 = vrot.slane %v446_v21, %v2847_v5  ;;  %v2929_v52 = vrot.slane %v446_v21, %v2849_v6  ;;  %v2932_v53 = vrot.slane %v446_v21, %v2851_v7 }
  0x1b   : > { %400 = vst.msk [vmem:[#allocation2 + $0xb9] sm:$0x1] %vm374_vm1, %v3875_v2  ;;  %401 = vst.msk [vmem:[#allocation2 + $0xd1] sm:$0x1] %vm374_vm1, %v3875_v2  ;;  %v345_v40 = vld [vmem:[%s2860_s19 + $0x60] sm:$0xff]  ;;  %v346_v41 = vld [vmem:[%s2860_s19 + $0x68] sm:$0xff] }
  0x1c   : > { %402 = vst.msk [vmem:[#allocation2 + $0xe9] sm:$0x1] %vm374_vm1, %v3875_v2  ;;  %403 = vst.msk [vmem:[#allocation2 + $0x101] sm:$0x1] %vm374_vm1, %v3875_v2  ;;  %v347_v42 = vld [vmem:[%s2860_s19 + $0x70] sm:$0xff]  ;;  %v348_v45 = vld [vmem:[%s2860_s19 + $0x78] sm:$0xff] }
  0x1d   : > { %404 = vst.msk [vmem:[#allocation2 + $0x119] sm:$0x1] %vm374_vm1, %v3875_v2  ;;  %405 = vst.msk [vmem:[#allocation2 + $0x131] sm:$0x1] %vm374_vm1, %v3875_v2  ;;  %v351_v46 = vld [vmem:[%s2860_s19 + $0x90] sm:$0xff]  ;;  %v352_v47 = vld [vmem:[%s2860_s19 + $0x98] sm:$0xff] }
  0x1e   : > { %406 = vst.msk [vmem:[#allocation2 + $0x149] sm:$0x1] %vm374_vm1, %v3875_v2  ;;  %407 = vst.msk [vmem:[#allocation2 + $0x161] sm:$0x1] %vm374_vm1, %v3875_v2  ;;  %vm1783_vm5 = vcmask 254976   ;;  %s2547_s29 = sshll.u32 %s3888_s10, 4 }
  0x1f   : > { %408 = vst.msk [vmem:[#allocation2 + $0x179] sm:$0x1] %vm374_vm1, %v3875_v2  ;;  %409 = vst.msk [vmem:[#allocation2 + $0x191] sm:$0x1] %vm374_vm1, %v3875_v2  ;;  %s332_s13 = scalar_lea.vmem %s3874_s9, %s2547_s29  ;;  %vm2387_vm6 = vcmask 523264  }
  0x20   : > { %375 = vst.msk [vmem:[#allocation2] sm:$0x1] %vm374_vm1, %v3875_v2  ;;  %392 = vst.msk [vmem:[#allocation2 + $0x198] sm:$0x1] %vm374_vm1, %v3875_v2 }
  0x21   : > { %369 = vst.msk [vmem:[#allocation2 + $0x10] sm:$0x3] %vm368_vm2, %v3875_v2  ;;  %373 = vst.msk [vmem:[#allocation2 + $0x1a8] sm:$0x3] %vm368_vm2, %v3875_v2 }
  0x22   : > { %3882 = vst [vmem:[#allocation4_spill] sm:$0xff] %v2849_v6  ;;  %3883 = vst [vmem:[#allocation5_spill] sm:$0xff] %v2851_v7 }
  0x23   : > { %393 = vst.msk [vmem:[#allocation2 + $0x11] sm:$0x1] %vm374_vm1, %v3875_v2  ;;  %410 = vst.msk [vmem:[#allocation2 + $0x1a9] sm:$0x1] %vm374_vm1, %v3875_v2 }
  0x24   : > { %412 = vst.msk [vmem:[#allocation2 + $0x19] sm:$0xff] %vm365_vm0, %v333_v8  ;;  %413 = vst.msk [vmem:[#allocation2 + $0x21] sm:$0xff] %vm365_vm0, %v334_v9 }
  0x25   : > { %414 = vst.msk [vmem:[#allocation2 + $0x31] sm:$0xff] %vm365_vm0, %v335_v10  ;;  %415 = vst.msk [vmem:[#allocation2 + $0x39] sm:$0xff] %vm365_vm0, %v336_v15 }
  0x26   : > { %416 = vst.msk [vmem:[#allocation2 + $0x49] sm:$0xff] %vm365_vm0, %v337_v16  ;;  %417 = vst.msk [vmem:[#allocation2 + $0x51] sm:$0xff] %vm365_vm0, %v338_v17 }
  0x27   : > { %v447_v22 = vld [vmem:[#allocation2] sm:$0xff]  ;;  %418 = vst.msk [vmem:[#allocation2 + $0x61] sm:$0xff] %vm365_vm0, %v339_v25  ;;  %419 = vst.msk [vmem:[#allocation2 + $0x69] sm:$0xff] %vm365_vm0, %v340_v26 }
  0x28   : > { %v483_v27 = vmul.f32 %v2869_v12, %v447_v22  ;;  %v548_v29 = vld [vmem:[#allocation2 + $0x9] sm:$0xff]  ;;  %420 = vst.msk [vmem:[#allocation2 + $0x79] sm:$0xff] %vm365_vm0, %v341_v30  ;;  %421 = vst.msk [vmem:[#allocation2 + $0x81] sm:$0xff] %vm365_vm0, %v342_v31 }
  0x29   : > { %v584_v34 = vmul.f32 %v2872_v13, %v548_v29  ;;  %422 = vst.msk [vmem:[#allocation2 + $0x91] sm:$0xff] %vm365_vm0, %v343_v36  ;;  %423 = vst.msk [vmem:[#allocation2 + $0x99] sm:$0xff] %vm365_vm0, %v344_v37 }
  0x2a   : > { %v648_v35 = vld [vmem:[#allocation2 + $0xa] sm:$0xff]  ;;  %v615_v38 = vadd.f32 %v583_v23, %v483_v27  ;;  %424 = vst.msk [vmem:[#allocation2 + $0xa9] sm:$0xff] %vm365_vm0, %v345_v40  ;;  %425 = vst.msk [vmem:[#allocation2 + $0xb1] sm:$0xff] %vm365_vm0, %v346_v41 }
  0x2b   : > { %v684_v39 = vmul.f32 %v2875_v14, %v648_v35  ;;  %v616_v44 = vadd.f32 %v584_v34, %v484_v24  ;;  %426 = vst.msk [vmem:[#allocation2 + $0xc1] sm:$0xff] %vm365_vm0, %v347_v42  ;;  %v747_v49 = vld [vmem:[#allocation2 + $0x18] sm:$0xff]  ;;  %427 = vst.msk [vmem:[#allocation2 + $0xc9] sm:$0xff] %vm365_vm0, %v348_v45  ;;  %v748_v58 = vld [vmem:[#allocation2 + $0x20] sm:$0xff] }
  0x2c   : > { %v715_v48 = vadd.f32 %v683_v28, %v615_v38  ;;  %v847_v50 = vld [vmem:[#allocation2 + $0x19] sm:$0xff]  ;;  %430 = vst.msk [vmem:[#allocation2 + $0xf1] sm:$0xff] %vm365_vm0, %v351_v46  ;;  %431 = vst.msk [vmem:[#allocation2 + $0xf9] sm:$0xff] %vm365_vm0, %v352_v47  ;;  %v783_v54 = vmul.f32 %v2900_v32, %v747_v49  ;;  %v848_v59 = vld [vmem:[#allocation2 + $0x21] sm:$0xff]  ;;  %v485_v60 = vmul.f32 %v747_v49, %v2869_v12 }
  0x2d   : > { %v883_v55 = vmul.f32 %v2903_v33, %v847_v50  ;;  %v716_v56 = vadd.f32 %v684_v39, %v616_v44  ;;  %v947_v57 = vld [vmem:[#allocation2 + $0x1a] sm:$0xff]  ;;  %v1048_v63 = vld [vmem:[#allocation2 + $0x30] sm:$0xff]  ;;  %v784_v3 = vmul.f32 %v2900_v32, %v748_v58  ;;  %v884_v4 = vmul.f32 %v2903_v33, %v848_v59  ;;  %v948_v11 = vld [vmem:[#allocation2 + $0x22] sm:$0xff] }
  0x2e   : > { %v815_v61 = vadd.f32 %v783_v54, %v715_v48  ;;  %v983_v62 = vmul.f32 %v2917_v43, %v947_v57  ;;  %v1148_v0 = vld [vmem:[#allocation2 + $0x31] sm:$0xff]  ;;  %v1084_v8 = vmul.f32 %v2926_v51, %v1048_v63  ;;  %v585_v15 = vmul.f32 %v847_v50, %v2872_v13  ;;  %v1149_v20 = vld [vmem:[#allocation2 + $0x39] sm:$0xff]  ;;  %v2957_v34 = vld [vmem:[#allocation2 + $0x48] sm:$0xff] }
  0x2f   : > { %v1248_v1 = vld [vmem:[#allocation2 + $0x32] sm:$0xff]  ;;  %v1184_v9 = vmul.f32 %v2929_v52, %v1148_v0  ;;  %v816_v17 = vadd.f32 %v784_v3, %v716_v56  ;;  %v984_v18 = vmul.f32 %v2917_v43, %v948_v11  ;;  %v685_v21 = vmul.f32 %v947_v57, %v2875_v14  ;;  %v2951_v24 = vld [vmem:[#allocation2 + $0x3a] sm:$0xff]  ;;  %v2965_v42 = vld [vmem:[#allocation2 + $0x49] sm:$0xff] }
  0x30   : > { %v1284_v10 = vmul.f32 %v2932_v53, %v1248_v1  ;;  %v915_v16 = vadd.f32 %v883_v55, %v815_v61  ;;  %v1049_v19 = vld [vmem:[#allocation2 + $0x38] sm:$0xff]  ;;  %v1185_v23 = vmul.f32 %v2929_v52, %v1149_v20  ;;  %v617_v25 = vadd.f32 %v585_v15, %v485_v60  ;;  %v2969_v46 = vld [vmem:[#allocation2 + $0x4a] sm:$0xff]  ;;  %v2978_v56 = vld [vmem:[%s3867_s2] ss:$0 sm:$0xff] }
  0x31   : > { %v1085_v22 = vmul.f32 %v2926_v51, %v1049_v19  ;;  %v785_v26 = vmul.f32 %v1048_v63, %v2900_v32  ;;  %v916_v28 = vadd.f32 %v884_v4, %v816_v17  ;;  %v1285_v29 = vmul.f32 %v2932_v53, %v2951_v24  ;;  %v2987_v15 = vld [vmem:[#allocation2 + $0x51] sm:$0xff] }
  0x32   : > { %v1015_v27 = vadd.f32 %v983_v62, %v915_v16  ;;  %v885_v30 = vmul.f32 %v1148_v0, %v2903_v33  ;;  %v717_v31 = vadd.f32 %v685_v21, %v617_v25  ;;  %v486_v35 = vmul.f32 %v748_v58, %v2869_v12  ;;  %v353_v25 = vld [vmem:[%s2860_s19 + $0xa0] sm:$0xff] }
  0x33   : > { %v586_v36 = vmul.f32 %v848_v59, %v2872_v13  ;;  %v686_v37 = vmul.f32 %v948_v11, %v2875_v14  ;;  %v1016_v39 = vadd.f32 %v984_v18, %v916_v28  ;;  %v985_v40 = vmul.f32 %v1248_v1, %v2917_v43  ;;  %v2985_v11 = vld [vmem:[#allocation2 + $0x50] sm:$0xff]  ;;  %432 = vst.msk [vmem:[#allocation2 + $0x109] sm:$0xff] %vm365_vm0, %v353_v25  ;;  %v1053_v25 = vld [vmem:[#allocation2 + $0x68] sm:$0xff] }
  0x34   : > { %v1116_v38 = vadd.f32 %v1084_v8, %v1015_v27  ;;  %v1086_v41 = vmul.f32 %v2926_v51, %v2957_v34  ;;  %v817_v44 = vadd.f32 %v785_v26, %v717_v31  ;;  %v1186_v45 = vmul.f32 %v2929_v52, %v2965_v42  ;;  %v354_v26 = vld [vmem:[%s2860_s19 + $0xa8] sm:$0xff]  ;;  %v355_v27 = vld [vmem:[%s2860_s19 + $0xb0] sm:$0xff] }
  0x35   : > { %v618_v47 = vadd.f32 %v586_v36, %v486_v35  ;;  %v786_v48 = vmul.f32 %v1049_v19, %v2900_v32  ;;  %v1117_v50 = vadd.f32 %v1085_v22, %v1016_v39  ;;  %v1286_v54 = vmul.f32 %v2932_v53, %v2969_v46  ;;  %v356_v35 = vld [vmem:[%s2860_s19 + $0xb8] sm:$0xff]  ;;  %433 = vst.msk [vmem:[#allocation2 + $0x111] sm:$0xff] %vm365_vm0, %v354_v26 }
  0x36   : > { %v1216_v49 = vadd.f32 %v1184_v9, %v1116_v38  ;;  %v886_v55 = vmul.f32 %v1149_v20, %v2903_v33  ;;  %v917_v57 = vadd.f32 %v885_v30, %v817_v44  ;;  %v487_v59 = vmul.f32 %v1048_v63, %v2869_v12  ;;  %434 = vst.msk [vmem:[#allocation2 + $0x121] sm:$0xff] %vm365_vm0, %v355_v27  ;;  %v3011_v38 = vld [vmem:[#allocation2 + $0x52] sm:$0xff] }
  0x37   : > { %v718_v58 = vadd.f32 %v686_v37, %v618_v47  ;;  %v587_v60 = vmul.f32 %v1148_v0, %v2872_v13  ;;  %v1217_v62 = vadd.f32 %v1185_v23, %v1117_v50  ;;  %v986_v3 = vmul.f32 %v2951_v24, %v2917_v43  ;;  %435 = vst.msk [vmem:[#allocation2 + $0x129] sm:$0xff] %vm365_vm0, %v356_v35  ;;  %v349_v47 = vld [vmem:[%s2860_s19 + $0x80] sm:$0xff]  ;;  %v1153_v35 = vld [vmem:[#allocation2 + $0x69] sm:$0xff] }
  0x38   : > { %v1316_v61 = vadd.f32 %v1284_v10, %v1216_v49  ;;  %v687_v4 = vmul.f32 %v1248_v1, %v2875_v14  ;;  %v1017_v8 = vadd.f32 %v985_v40, %v917_v57  ;;  %v787_v63 = vmul.f32 %v2957_v34, %v2900_v32  ;;  %v3013_v40 = vld [vmem:[#allocation2 + $0x60] sm:$0xff]  ;;  %428 = vst.msk [vmem:[#allocation2 + $0xd9] sm:$0xff] %vm365_vm0, %v349_v47 }
  0x39   : > { %v818_v9 = vadd.f32 %v786_v48, %v718_v58  ;;  %v619_v16 = vadd.f32 %v587_v60, %v487_v59  ;;  %v1317_v10 = vadd.f32 %v1285_v29, %v1217_v62  ;;  %v1087_v17 = vmul.f32 %v2926_v51, %v2985_v11  ;;  %v350_v48 = vld [vmem:[%s2860_s19 + $0x88] sm:$0xff]  ;;  %v357_v57 = vld [vmem:[%s2860_s19 + $0xc0] sm:$0xff]  ;;  %v359_v59 = vld [vmem:[%s2860_s19 + $0xd0] sm:$0xff] }
  0x3a   : > { %v1355_v0 = vadd.f32 %v2978_v56, %v1316_v61  ;;  %v1187_v1 = vmul.f32 %v2929_v52, %v2987_v15  ;;  %v1118_v18 = vadd.f32 %v1086_v41, %v1017_v8  ;;  %v887_v23 = vmul.f32 %v2965_v42, %v2903_v33  ;;  %v3021_v41 = vld [vmem:[#allocation2 + $0x61] sm:$0xff]  ;;  %429 = vst.msk [vmem:[#allocation2 + $0xe1] sm:$0xff] %vm365_vm0, %v350_v48 }
  0x3b   : > { %v918_v21 = vadd.f32 %v886_v55, %v818_v9  ;;  %v719_v22 = vadd.f32 %v687_v4, %v619_v16  ;;  %v1356_v28 = vadd.f32 %v2978_v56, %v1317_v10  ;;  %v987_v29 = vmul.f32 %v2969_v46, %v2917_v43  ;;  %v358_v58 = vld [vmem:[%s2860_s19 + $0xc8] sm:$0xff]  ;;  %436 = vst.msk [vmem:[#allocation2 + $0x139] sm:$0xff] %vm365_vm0, %v357_v57  ;;  %v361_v4 = vld [vmem:[%s2860_s19 + $0xe0] sm:$0xff] }
  0x3c   : > { %2595 = vmatprep.mubr.msk.f32.mxu0 %vm365_vm0, %v1355_v0  ;;  %v488_v30 = vmul.f32 %v1049_v19, %v2869_v12  ;;  %v588_v31 = vmul.f32 %v1149_v20, %v2872_v13  ;;  %v1218_v36 = vadd.f32 %v1186_v45, %v1118_v18  ;;  %v688_v19 = vmul.f32 %v2951_v24, %v2875_v14  ;;  %v362_v8 = vld [vmem:[%s2860_s19 + $0xe8] sm:$0xff] }
  0x3d   : > { %v1018_v37 = vadd.f32 %v986_v3, %v918_v21  ;;  %v819_v39 = vadd.f32 %v787_v63, %v719_v22  ;;  %2596 = vmatmul.mubr.msk.f32.vlgmr.msra.gmra.mrb[0].mxu0 %vm365_vm0, %v1356_v28  ;;  %v1287_v20 = vmul.f32 %v2932_v53, %v3011_v38  ;;  %v788_v45 = vmul.f32 %v2985_v11, %v2900_v32  ;;  %v360_v3 = vld [vmem:[%s2860_s19 + $0xd8] sm:$0xff]  ;;  %v1252_v0 = vld [vmem:[#allocation2 + $0x62] sm:$0xff] }
  0x3e   : > { %v620_v44 = vadd.f32 %v588_v31, %v488_v30  ;;  %v1318_v49 = vadd.f32 %v1286_v54, %v1218_v36  ;;  %v1088_v55 = vmul.f32 %v2926_v51, %v3013_v40  ;;  %v1188_v60 = vmul.f32 %v2929_v52, %v3021_v41  ;;  %437 = vst.msk [vmem:[#allocation2 + $0x141] sm:$0xff] %vm365_vm0, %v358_v58 }
  0x3f   : > { %v1119_v24 = vadd.f32 %v1087_v17, %v1018_v37  ;;  %v919_v50 = vadd.f32 %v887_v23, %v819_v39  ;;  %v888_v54 = vmul.f32 %v2987_v15, %v2903_v33  ;;  %v489_v62 = vmul.f32 %v2957_v34, %v2869_v12  ;;  %438 = vst.msk [vmem:[#allocation2 + $0x151] sm:$0xff] %vm365_vm0, %v359_v59  ;;  %v363_v34 = vld [vmem:[%s2860_s19 + $0xf0] sm:$0xff]  ;;  %v364_v17 = vld [vmem:[%s2860_s19 + $0xf8] sm:$0xff] }
  0x40   : > { %v720_v61 = vadd.f32 %v688_v19, %v620_v44  ;;  %v1357_v9 = vadd.f32 %v2978_v56, %v1318_v49  ;;  %v589_v10 = vmul.f32 %v2965_v42, %v2872_v13  ;;  %439 = vst.msk [vmem:[#allocation2 + $0x159] sm:$0xff] %vm365_vm0, %v360_v3  ;;  %440 = vst.msk [vmem:[#allocation2 + $0x169] sm:$0xff] %vm365_vm0, %v361_v4 }
  0x41   : > { %v1219_v16 = vadd.f32 %v1187_v1, %v1119_v24  ;;  %v1019_v63 = vadd.f32 %v987_v29, %v919_v50  ;;  %441 = vst.msk [vmem:[#allocation2 + $0x171] sm:$0xff] %vm365_vm0, %v362_v8  ;;  %v1288_v18 = vmul.f32 %v2932_v53, %v1252_v0  ;;  %v988_v22 = vmul.f32 %v3011_v38, %v2917_v43  ;;  %v1054_v50 = vld [vmem:[#allocation2 + $0x78] sm:$0xff] }
  0x42   : > { %v820_v21 = vadd.f32 %v788_v45, %v720_v61  ;;  %v689_v1 = vmul.f32 %v2969_v46, %v2875_v14  ;;  %442 = vst.msk [vmem:[#allocation2 + $0x181] sm:$0xff] %vm365_vm0, %v363_v34  ;;  %443 = vst.msk [vmem:[#allocation2 + $0x189] sm:$0xff] %vm365_vm0, %v364_v17  ;;  %2598 = vmatprep.mubr.msk.f32.mxu0 %vm365_vm0, %v1357_v9  ;;  %v621_v26 = vadd.f32 %v589_v10, %v489_v62  ;;  %v1254_v62 = vld [vmem:[#allocation2 + $0x7a] sm:$0xff] }
  0x43   : > { %v1319_v42 = vadd.f32 %v1287_v20, %v1219_v16  ;;  %v1120_v23 = vadd.f32 %v1088_v55, %v1019_v63  ;;  %v789_v27 = vmul.f32 %v3013_v40, %v2900_v32  ;;  %v1089_v29 = vmul.f32 %v2926_v51, %v1053_v25  ;;  %v1253_v20 = vld [vmem:[#allocation2 + $0x6a] sm:$0xff]  ;;  %v1055_v17 = vld [vmem:[#allocation2 + $0x80] sm:$0xff] }
  0x44   : > { %v920_v28 = vadd.f32 %v888_v54, %v820_v21  ;;  %v889_v30 = vmul.f32 %v3021_v41, %v2903_v33  ;;  %v721_v36 = vadd.f32 %v689_v1, %v621_v26  ;;  %v490_v37 = vmul.f32 %v2985_v11, %v2869_v12  ;;  %v1154_v54 = vld [vmem:[#allocation2 + $0x79] sm:$0xff]  ;;  %v1155_v26 = vld [vmem:[#allocation2 + $0x81] sm:$0xff] }
  0x45   : > { %v1358_v46 = vadd.f32 %v2978_v56, %v1319_v42  ;;  %v1220_v31 = vadd.f32 %v1188_v60, %v1120_v23  ;;  %v1189_v19 = vmul.f32 %v2929_v52, %v1153_v35  ;;  %v590_v44 = vmul.f32 %v2987_v15, %v2872_v13  ;;  %v3358_v6 = vld [vmem:[#allocation2 + $0x139] sm:$0xff] }
  0x46   : > { %v1020_v39 = vadd.f32 %v988_v22, %v920_v28  ;;  %v690_v45 = vmul.f32 %v3011_v38, %v2875_v14  ;;  %v1289_v48 = vmul.f32 %v2932_v53, %v1253_v20  ;;  %v821_v49 = vadd.f32 %v789_v27, %v721_v36 }
  0x47   : > { %2599 = vmatmul.mubr.msk.f32.gmra.mrb[2].mxu0 %vm365_vm0, %v1358_v46  ;;  %v1320_v47 = vadd.f32 %v1288_v18, %v1220_v31  ;;  %v989_v24 = vmul.f32 %v1252_v0, %v2917_v43  ;;  %v1090_v55 = vmul.f32 %v2926_v51, %v1054_v50  ;;  %v622_v57 = vadd.f32 %v590_v44, %v490_v37  ;;  %v1255_v37 = vld [vmem:[#allocation2 + $0x82] sm:$0xff] }
  0x48   : > { %v1121_v11 = vadd.f32 %v1089_v29, %v1020_v39  ;;  %v790_v58 = vmul.f32 %v1053_v25, %v2900_v32  ;;  %v921_v59 = vadd.f32 %v889_v30, %v821_v49  ;;  %v890_v38 = vmul.f32 %v1153_v35, %v2903_v33 }
  0x49   : > { %v1359_v15 = vadd.f32 %v2978_v56, %v1320_v47  ;;  %v491_v60 = vmul.f32 %v3013_v40, %v2869_v12  ;;  %v722_v3 = vadd.f32 %v690_v45, %v622_v57  ;;  %v591_v4 = vmul.f32 %v3021_v41, %v2872_v13 }
  0x4a   : > { %v1221_v61 = vadd.f32 %v1189_v19, %v1121_v11  ;;  %v691_v8 = vmul.f32 %v1252_v0, %v2875_v14  ;;  %v1021_v9 = vadd.f32 %v989_v24, %v921_v59  ;;  %v1190_v16 = vmul.f32 %v2929_v52, %v1154_v54  ;;  %v1156_v11 = vld [vmem:[#allocation2 + $0x91] sm:$0xff] }
  0x4b   : > { %2601 = vmatprep.mubr.msk.f32.mxu0 %vm365_vm0, %v1359_v15  ;;  %v1290_v63 = vmul.f32 %v2932_v53, %v1254_v62  ;;  %v990_v10 = vmul.f32 %v1253_v20, %v2917_v43  ;;  %v822_v40 = vadd.f32 %v790_v58, %v722_v3  ;;  %v623_v18 = vadd.f32 %v591_v4, %v491_v60 }
  0x4c   : > { %v1321_v34 = vadd.f32 %v1289_v48, %v1221_v61  ;;  %v791_v21 = vmul.f32 %v1054_v50, %v2900_v32  ;;  %v1122_v22 = vadd.f32 %v1090_v55, %v1021_v9  ;;  %v1091_v41 = vmul.f32 %v2926_v51, %v1055_v17  ;;  %v1256_v61 = vld [vmem:[#allocation2 + $0x92] sm:$0xff] }
  0x4d   : > { %v891_v0 = vmul.f32 %v1154_v54, %v2903_v33  ;;  %v492_v1 = vmul.f32 %v1053_v25, %v2869_v12  ;;  %v922_v23 = vadd.f32 %v890_v38, %v822_v40  ;;  %v723_v27 = vadd.f32 %v691_v8, %v623_v18  ;;  %v1056_v25 = vld [vmem:[#allocation2 + $0x90] sm:$0xff]  ;;  %v1057_v8 = vld [vmem:[#allocation2 + $0x98] sm:$0xff] }
  0x4e   : > { %v1360_v42 = vadd.f32 %v2978_v56, %v1321_v34  ;;  %v592_v28 = vmul.f32 %v1153_v35, %v2872_v13  ;;  %v1222_v29 = vadd.f32 %v1190_v16, %v1122_v22  ;;  %v1191_v30 = vmul.f32 %v2929_v52, %v1155_v26  ;;  %v1157_v40 = vld [vmem:[#allocation2 + $0x99] sm:$0xff] }
  0x4f   : > { %v991_v46 = vmul.f32 %v1254_v62, %v2917_v43  ;;  %v692_v31 = vmul.f32 %v1253_v20, %v2875_v14  ;;  %v1022_v36 = vadd.f32 %v990_v10, %v922_v23  ;;  %v823_v39 = vadd.f32 %v791_v21, %v723_v27  ;;  %v1257_v27 = vld [vmem:[#allocation2 + $0x9a] sm:$0xff] }
  0x50   : > { %2602 = vmatmul.mubr.msk.f32.gmra.mrb[4].mxu0 %vm365_vm0, %v1360_v42  ;;  %v624_v19 = vadd.f32 %v592_v28, %v492_v1  ;;  %v792_v44 = vmul.f32 %v1055_v17, %v2900_v32  ;;  %v1322_v45 = vadd.f32 %v1290_v63, %v1222_v29  ;;  %v1291_v47 = vmul.f32 %v2932_v53, %v1255_v37 }
  0x51   : > { %v1092_v35 = vmul.f32 %v2926_v51, %v1056_v25  ;;  %v892_v48 = vmul.f32 %v1155_v26, %v2903_v33  ;;  %v1123_v49 = vadd.f32 %v1091_v41, %v1022_v36  ;;  %v923_v24 = vadd.f32 %v891_v0, %v823_v39 }
  0x52   : > { %v724_v20 = vadd.f32 %v692_v31, %v624_v19  ;;  %v493_v55 = vmul.f32 %v1054_v50, %v2869_v12  ;;  %v1361_v57 = vadd.f32 %v2978_v56, %v1322_v45  ;;  %v1192_v58 = vmul.f32 %v2929_v52, %v1156_v11 }
  0x53   : > { %v593_v15 = vmul.f32 %v1154_v54, %v2872_v13  ;;  %v693_v59 = vmul.f32 %v1254_v62, %v2875_v14  ;;  %v1223_v38 = vadd.f32 %v1191_v30, %v1123_v49  ;;  %v1023_v60 = vadd.f32 %v991_v46, %v923_v24  ;;  %v3122_v30 = vld [vmem:[#allocation2 + $0xa8] sm:$0xff] }
  0x54   : > { %v824_v3 = vadd.f32 %v792_v44, %v724_v20  ;;  %v992_v4 = vmul.f32 %v1255_v37, %v2917_v43  ;;  %2604 = vmatprep.mubr.msk.f32.mxu0 %vm365_vm0, %v1361_v57  ;;  %v1292_v9 = vmul.f32 %v2932_v53, %v1256_v61  ;;  %v1093_v50 = vmul.f32 %v2926_v51, %v1057_v8  ;;  %v3138_v57 = vld [vmem:[#allocation2 + $0xaa] sm:$0xff] }
  0x55   : > { %v625_v16 = vadd.f32 %v593_v15, %v493_v55  ;;  %v793_v63 = vmul.f32 %v1056_v25, %v2900_v32  ;;  %v1323_v10 = vadd.f32 %v1291_v47, %v1223_v38  ;;  %v1124_v54 = vadd.f32 %v1092_v35, %v1023_v60  ;;  %v3144_v38 = vld [vmem:[#allocation2 + $0xb0] sm:$0xff] }
  0x56   : > { %v924_v34 = vadd.f32 %v892_v48, %v824_v3  ;;  %v893_v62 = vmul.f32 %v1156_v11, %v2903_v33  ;;  %v494_v21 = vmul.f32 %v1055_v17, %v2869_v12  ;;  %v594_v22 = vmul.f32 %v1155_v26, %v2872_v13  ;;  %v3132_v48 = vld [vmem:[#allocation2 + $0xa9] sm:$0xff] }
  0x57   : > { %v725_v18 = vadd.f32 %v693_v59, %v625_v16  ;;  %v694_v41 = vmul.f32 %v1255_v37, %v2875_v14  ;;  %v1362_v0 = vadd.f32 %v2978_v56, %v1323_v10  ;;  %v1224_v1 = vadd.f32 %v1192_v58, %v1124_v54  ;;  %v3153_v16 = vld [vmem:[#allocation2 + $0xb1] sm:$0xff] }
  0x58   : > { %v1024_v42 = vadd.f32 %v992_v4, %v924_v34  ;;  %v1193_v23 = vmul.f32 %v2929_v52, %v1157_v40  ;;  %v993_v29 = vmul.f32 %v1256_v61, %v2917_v43  ;;  %v626_v46 = vadd.f32 %v594_v22, %v494_v21  ;;  %v3159_v21 = vld [vmem:[#allocation2 + $0xb2] sm:$0xff] }
  0x59   : > { %v825_v28 = vadd.f32 %v793_v63, %v725_v18  ;;  %v794_v31 = vmul.f32 %v1057_v8, %v2900_v32  ;;  %2605 = vmatmul.mubr.msk.f32.gmra.mrb[6].mxu0 %vm365_vm0, %v1362_v0  ;;  %v1324_v17 = vadd.f32 %v1292_v9, %v1224_v1  ;;  %v1293_v36 = vmul.f32 %v2932_v53, %v1257_v27 }
  0x5a   : > { %v1125_v26 = vadd.f32 %v1093_v50, %v1024_v42  ;;  %v1094_v37 = vmul.f32 %v2926_v51, %v3122_v30  ;;  %v726_v19 = vadd.f32 %v694_v41, %v626_v46  ;;  %v894_v44 = vmul.f32 %v1157_v40, %v2903_v33  ;;  %v3162_v41 = vld [vmem:[#allocation2 + $0xf0] sm:$0xff] }
  0x5b   : > { %v925_v39 = vadd.f32 %v893_v62, %v825_v28  ;;  %v495_v45 = vmul.f32 %v1056_v25, %v2869_v12  ;;  %v1363_v47 = vadd.f32 %v2978_v56, %v1324_v17  ;;  %v595_v49 = vmul.f32 %v1156_v11, %v2872_v13  ;;  %v3173_v28 = vld [vmem:[#allocation2 + $0xf2] sm:$0xff] }
  0x5c   : > { %v1225_v35 = vadd.f32 %v1193_v23, %v1125_v26  ;;  %v695_v24 = vmul.f32 %v1256_v61, %v2875_v14  ;;  %v1194_v55 = vmul.f32 %v2929_v52, %v3132_v48  ;;  %v826_v58 = vadd.f32 %v794_v31, %v726_v19  ;;  %v3171_v23 = vld [vmem:[#allocation2 + $0xf1] sm:$0xff] }
  0x5d   : > { %v1025_v20 = vadd.f32 %v993_v29, %v925_v39  ;;  %v994_v15 = vmul.f32 %v1257_v27, %v2917_v43  ;;  %2607 = vmatprep.mubr.msk.f32.mxu0 %vm365_vm0, %v1363_v47  ;;  %v1294_v59 = vmul.f32 %v2932_v53, %v3138_v57  ;;  %v627_v11 = vadd.f32 %v595_v49, %v495_v45  ;;  %v3183_v39 = vld [vmem:[#allocation2 + $0x108] sm:$0xff] }
  0x5e   : > { %v1325_v25 = vadd.f32 %v1293_v36, %v1225_v35  ;;  %v795_v60 = vmul.f32 %v3122_v30, %v2900_v32  ;;  %v926_v3 = vadd.f32 %v894_v44, %v826_v58  ;;  %v1095_v4 = vmul.f32 %v2926_v51, %v3144_v38  ;;  %v3186_v45 = vld [vmem:[#allocation2 + $0xc1] sm:$0xff] }
  0x5f   : > { %v1126_v61 = vadd.f32 %v1094_v37, %v1025_v20  ;;  %v895_v9 = vmul.f32 %v3132_v48, %v2903_v33  ;;  %v727_v63 = vadd.f32 %v695_v24, %v627_v11  ;;  %v496_v10 = vmul.f32 %v1057_v8, %v2869_v12  ;;  %v3167_v8 = vld [vmem:[#allocation2 + $0xc0] sm:$0xff] }
  0x60   : > { %v1364_v50 = vadd.f32 %v2978_v56, %v1325_v25  ;;  %v596_v54 = vmul.f32 %v1157_v40, %v2872_v13  ;;  %v1026_v62 = vadd.f32 %v994_v15, %v926_v3  ;;  %v1195_v18 = vmul.f32 %v2929_v52, %v3153_v16  ;;  %v3194_v20 = vld [vmem:[#allocation2 + $0xc2] sm:$0xff]  ;;  %v3198_v15 = vld [vmem:[#allocation2 + $0xf8] sm:$0xff] }
  0x61   : > { %v1226_v34 = vadd.f32 %v1194_v55, %v1126_v61  ;;  %v696_v22 = vmul.f32 %v1257_v27, %v2875_v14  ;;  %v827_v0 = vadd.f32 %v795_v60, %v727_v63  ;;  %v995_v1 = vmul.f32 %v3138_v57, %v2917_v43  ;;  %v3200_v25 = vld [vmem:[#allocation2 + $0xf9] sm:$0xff]  ;;  %v3205_v60 = vld [vmem:[#allocation2 + $0xc8] sm:$0xff] }
  0x62   : > { %2608 = vmatmul.mubr.msk.f32.gmra.mrb[8].mxu0 %vm365_vm0, %v1364_v50  ;;  %v628_v40 = vadd.f32 %v596_v54, %v496_v10  ;;  %v796_v42 = vmul.f32 %v3144_v38, %v2900_v32  ;;  %v1127_v27 = vadd.f32 %v1095_v4, %v1026_v62  ;;  %v1295_v46 = vmul.f32 %v2932_v53, %v3159_v21  ;;  %v3209_v4 = vld [vmem:[#allocation2 + $0x109] sm:$0xff] }
  0x63   : > { %v1326_v29 = vadd.f32 %v1294_v59, %v1226_v34  ;;  %v1096_v31 = vmul.f32 %v2926_v51, %v3167_v8  ;;  %v927_v17 = vadd.f32 %v895_v9, %v827_v0  ;;  %v896_v36 = vmul.f32 %v3153_v16, %v2903_v33  ;;  %v3211_v9 = vld [vmem:[#allocation2 + $0xfa] sm:$0xff]  ;;  %v3217_v34 = vld [vmem:[#allocation2 + $0x110] sm:$0xff] }
  0x64   : > { %v728_v26 = vadd.f32 %v696_v22, %v628_v40  ;;  %v503_v37 = vmul.f32 %v2869_v12, %v3162_v41  ;;  %v1227_v44 = vadd.f32 %v1195_v18, %v1127_v27  ;;  %v603_v47 = vmul.f32 %v2872_v13, %v3171_v23  ;;  %v3220_v18 = vld [vmem:[#allocation2 + $0xc9] sm:$0xff] }
  0x65   : > { %v1365_v19 = vadd.f32 %v2978_v56, %v1326_v29  ;;  %v703_v35 = vmul.f32 %v2875_v14, %v3173_v28  ;;  %v1027_v49 = vadd.f32 %v995_v1, %v927_v17  ;;  %v1196_v24 = vmul.f32 %v2929_v52, %v3186_v45  ;;  %v3228_v27 = vld [vmem:[#allocation2 + $0x10a] sm:$0xff] }
  0x66   : > { %v828_v55 = vadd.f32 %v796_v42, %v728_v26  ;;  %v996_v58 = vmul.f32 %v3159_v21, %v2917_v43  ;;  %v1327_v59 = vadd.f32 %v1295_v46, %v1227_v44  ;;  %v1296_v11 = vmul.f32 %v2932_v53, %v3194_v20 }
  0x67   : > { %2610 = vmatprep.mubr.msk.f32.mxu0 %vm365_vm0, %v1365_v19  ;;  %v635_v61 = vadd.f32 %v603_v47, %v503_v37  ;;  %v803_v3 = vmul.f32 %v2900_v32, %v3183_v39  ;;  %v1128_v50 = vadd.f32 %v1096_v31, %v1027_v49  ;;  %v1097_v10 = vmul.f32 %v2926_v51, %v3205_v60  ;;  %v3233_v31 = vld [vmem:[#allocation2 + $0xca] sm:$0xff] }
  0x68   : > { %v928_v63 = vadd.f32 %v896_v36, %v828_v55  ;;  %v903_v54 = vmul.f32 %v2903_v33, %v3209_v4  ;;  %v1366_v62 = vadd.f32 %v2978_v56, %v1327_v59  ;;  %v504_v0 = vmul.f32 %v2869_v12, %v3198_v15  ;;  %v3237_v36 = vld [vmem:[#allocation2 + $0x120] sm:$0xff] }
  0x69   : > { %v735_v22 = vadd.f32 %v703_v35, %v635_v61  ;;  %v604_v1 = vmul.f32 %v2872_v13, %v3200_v25  ;;  %v1228_v40 = vadd.f32 %v1196_v24, %v1128_v50  ;;  %v1197_v29 = vmul.f32 %v2929_v52, %v3220_v18  ;;  %v3245_v24 = vld [vmem:[#allocation2 + $0x111] sm:$0xff]  ;;  %v3252_v50 = vld [vmem:[#allocation2 + $0x121] sm:$0xff] }
  0x6a   : > { %v1028_v42 = vadd.f32 %v996_v58, %v928_v63  ;;  %v704_v46 = vmul.f32 %v2875_v14, %v3211_v9  ;;  %2611 = vmatmul.mubr.msk.f32.gmra.mrb[10].mxu0 %vm365_vm0, %v1366_v62  ;;  %v1003_v26 = vmul.f32 %v2917_v43, %v3228_v27  ;;  %v804_v19 = vmul.f32 %v2900_v32, %v3217_v34  ;;  %v3254_v63 = vld [vmem:[#allocation2 + $0x112] sm:$0xff] }
  0x6b   : > { %v835_v17 = vadd.f32 %v803_v3, %v735_v22  ;;  %v636_v37 = vadd.f32 %v604_v1, %v504_v0  ;;  %v1328_v44 = vadd.f32 %v1296_v11, %v1228_v40  ;;  %v1297_v35 = vmul.f32 %v2932_v53, %v3233_v31  ;;  %v3262_v0 = vld [vmem:[#allocation2 + $0x122] sm:$0xff] }
  0x6c   : > { %v1129_v47 = vadd.f32 %v1097_v10, %v1028_v42  ;;  %v1104_v49 = vmul.f32 %v2926_v51, %v3237_v36  ;;  %v904_v59 = vmul.f32 %v2903_v33, %v3245_v24  ;;  %v497_v61 = vmul.f32 %v3122_v30, %v2869_v12 }
  0x6d   : > { %v935_v55 = vadd.f32 %v903_v54, %v835_v17  ;;  %v736_v58 = vadd.f32 %v704_v46, %v636_v37  ;;  %v1367_v3 = vadd.f32 %v2978_v56, %v1328_v44  ;;  %v597_v10 = vmul.f32 %v3132_v48, %v2872_v13  ;;  %v3269_v48 = vld [vmem:[#allocation2 + $0x128] sm:$0xff] }
  0x6e   : > { %v1229_v11 = vadd.f32 %v1197_v29, %v1129_v47  ;;  %v697_v54 = vmul.f32 %v3138_v57, %v2875_v14  ;;  %v1204_v22 = vmul.f32 %v2929_v52, %v3252_v50  ;;  %v1004_v1 = vmul.f32 %v2917_v43, %v3254_v63  ;;  %v3278_v44 = vld [vmem:[#allocation2 + $0x129] sm:$0xff] }
  0x6f   : > { %v1035_v62 = vadd.f32 %v1003_v26, %v935_v55  ;;  %v836_v30 = vadd.f32 %v804_v19, %v736_v58  ;;  %2613 = vmatprep.mubr.msk.f32.mxu0 %vm365_vm0, %v1367_v3  ;;  %v1304_v42 = vmul.f32 %v2932_v53, %v3262_v0  ;;  %v629_v29 = vadd.f32 %v597_v10, %v497_v61  ;;  %v3289_v3 = vld [vmem:[#allocation2 + $0x12a] sm:$0xff] }
  0x70   : > { %v1329_v40 = vadd.f32 %v1297_v35, %v1229_v11  ;;  %v797_v57 = vmul.f32 %v3167_v8, %v2900_v32  ;;  %v1105_v26 = vmul.f32 %v2926_v51, %v3269_v48  ;;  %v897_v37 = vmul.f32 %v3186_v45, %v2903_v33 }
  0x71   : > { %v1136_v46 = vadd.f32 %v1104_v49, %v1035_v62  ;;  %v936_v17 = vadd.f32 %v904_v59, %v836_v30  ;;  %v729_v47 = vadd.f32 %v697_v54, %v629_v29  ;;  %v498_v35 = vmul.f32 %v3144_v38, %v2869_v12  ;;  %v3293_v38 = vld [vmem:[#allocation2 + $0xd8] sm:$0xff] }
  0x72   : > { %v1368_v19 = vadd.f32 %v2978_v56, %v1329_v40  ;;  %v598_v55 = vmul.f32 %v3153_v16, %v2872_v13  ;;  %v1205_v59 = vmul.f32 %v2929_v52, %v3278_v44  ;;  %v698_v61 = vmul.f32 %v3159_v21, %v2875_v14 }
  0x73   : > { %v1236_v58 = vadd.f32 %v1204_v22, %v1136_v46  ;;  %v1036_v49 = vadd.f32 %v1004_v1, %v936_v17  ;;  %v829_v11 = vadd.f32 %v797_v57, %v729_v47  ;;  %v997_v10 = vmul.f32 %v3194_v20, %v2917_v43 }
  0x74   : > { %2614 = vmatmul.mubr.msk.f32.gmra.mrb[12].mxu0 %vm365_vm0, %v1368_v19  ;;  %v630_v54 = vadd.f32 %v598_v55, %v498_v35  ;;  %v798_v16 = vmul.f32 %v3205_v60, %v2900_v32  ;;  %v1305_v30 = vmul.f32 %v2932_v53, %v3289_v3  ;;  %v1098_v21 = vmul.f32 %v2926_v51, %v3293_v38  ;;  %v3306_v19 = vld [vmem:[#allocation2 + $0xd9] sm:$0xff] }
  0x75   : > { %v1336_v62 = vadd.f32 %v1304_v42, %v1236_v58  ;;  %v1137_v22 = vadd.f32 %v1105_v26, %v1036_v49  ;;  %v929_v1 = vadd.f32 %v897_v37, %v829_v11  ;;  %v898_v29 = vmul.f32 %v3220_v18, %v2903_v33  ;;  %v3314_v35 = vld [vmem:[#allocation2 + $0xda] sm:$0xff] }
  0x76   : > { %v730_v40 = vadd.f32 %v698_v61, %v630_v54  ;;  %v505_v57 = vmul.f32 %v3183_v39, %v2869_v12  ;;  %v605_v42 = vmul.f32 %v3209_v4, %v2872_v13  ;;  %v705_v26 = vmul.f32 %v3228_v27, %v2875_v14  ;;  %v3321_v61 = vld [vmem:[#allocation2 + $0xe0] sm:$0xff] }
  0x77   : > { %v1375_v46 = vadd.f32 %v2978_v56, %v1336_v62  ;;  %v1237_v17 = vadd.f32 %v1205_v59, %v1137_v22  ;;  %v1029_v47 = vadd.f32 %v997_v10, %v929_v1  ;;  %v1198_v37 = vmul.f32 %v2929_v52, %v3306_v19 }
  0x78   : > { %v830_v55 = vadd.f32 %v798_v16, %v730_v40  ;;  %v998_v58 = vmul.f32 %v3233_v31, %v2917_v43  ;;  %v1298_v59 = vmul.f32 %v2932_v53, %v3314_v35  ;;  %v637_v11 = vadd.f32 %v605_v42, %v505_v57 }
  0x79   : > { %2625 = vmatprep.mubr.msk.f32.mxu1 %vm365_vm0, %v1375_v46  ;;  %v1337_v49 = vadd.f32 %v1305_v30, %v1237_v17  ;;  %v805_v10 = vmul.f32 %v3237_v36, %v2900_v32  ;;  %v1130_v54 = vadd.f32 %v1098_v21, %v1029_v47  ;;  %v1099_v16 = vmul.f32 %v2926_v51, %v3321_v61  ;;  %v3330_v30 = vld [vmem:[#allocation2 + $0xe1] sm:$0xff] }
  0x7a   : > { %v930_v62 = vadd.f32 %v898_v29, %v830_v55  ;;  %v905_v22 = vmul.f32 %v3252_v50, %v2903_v33  ;;  %v737_v40 = vadd.f32 %v705_v26, %v637_v11  ;;  %v506_v46 = vmul.f32 %v3217_v34, %v2869_v12  ;;  %v3341_v47 = vld [vmem:[#allocation2 + $0xe2] sm:$0xff] }
  0x7b   : > { %v1376_v1 = vadd.f32 %v2978_v56, %v1337_v49  ;;  %v606_v57 = vmul.f32 %v3245_v24, %v2872_v13  ;;  %v1230_v17 = vadd.f32 %v1198_v37, %v1130_v54  ;;  %v1199_v29 = vmul.f32 %v2929_v52, %v3330_v30  ;;  %v3345_v49 = vld [vmem:[#allocation2 + $0x138] sm:$0xff] }
  0x7c   : > { %v1030_v21 = vadd.f32 %v998_v58, %v930_v62  ;;  %v706_v42 = vmul.f32 %v3254_v63, %v2875_v14  ;;  %v837_v55 = vadd.f32 %v805_v10, %v737_v40  ;;  %v1005_v26 = vmul.f32 %v3262_v0, %v2917_v43 }
  0x7d   : > { %2626 = vmatmul.mubr.msk.f32.vlgmr.msra.gmra.mrb[0].mxu1 %vm365_vm0, %v1376_v1  ;;  %v638_v11 = vadd.f32 %v606_v57, %v506_v46  ;;  %v806_v37 = vmul.f32 %v3269_v48, %v2900_v32  ;;  %v1330_v58 = vadd.f32 %v1298_v59, %v1230_v17  ;;  %v1299_v62 = vmul.f32 %v2932_v53, %v3341_v47 }
  0x7e   : > { %v1131_v54 = vadd.f32 %v1099_v16, %v1030_v21  ;;  %v1106_v1 = vmul.f32 %v2926_v51, %v3345_v49  ;;  %v937_v2 = vadd.f32 %v905_v22, %v837_v55  ;;  %v906_v10 = vmul.f32 %v3278_v44, %v2903_v33  ;;  %v3366_v21 = vld [vmem:[#allocation2 + $0x13a] sm:$0xff] }
  0x7f   : > { %v738_v7 = vadd.f32 %v706_v42, %v638_v11  ;;  %v499_v40 = vmul.f32 %v3167_v8, %v2869_v12  ;;  %v1369_v46 = vadd.f32 %v2978_v56, %v1330_v58  ;;  %v599_v59 = vmul.f32 %v3186_v45, %v2872_v13  ;;  %v3373_v45 = vld [vmem:[#allocation2 + $0x140] sm:$0xff] }
  0x80   : > { %v1231_v57 = vadd.f32 %v1199_v29, %v1131_v54  ;;  %v699_v16 = vmul.f32 %v3194_v20, %v2875_v14  ;;  %v1037_v17 = vadd.f32 %v1005_v26, %v937_v2  ;;  %v1206_v22 = vmul.f32 %v2929_v52, %v3358_v6  ;;  %v3382_v54 = vld [vmem:[#allocation2 + $0x141] sm:$0xff] }
  0x81   : > { %v838_v42 = vadd.f32 %v806_v37, %v738_v7  ;;  %v1006_v8 = vmul.f32 %v3289_v3, %v2917_v43  ;;  %2616 = vmatprep.mubr.msk.f32.mxu0 %vm365_vm0, %v1369_v46  ;;  %v1306_v55 = vmul.f32 %v2932_v53, %v3366_v21  ;;  %v631_v11 = vadd.f32 %v599_v59, %v499_v40 }
  0x82   : > { %v1331_v29 = vadd.f32 %v1299_v62, %v1231_v57  ;;  %v799_v2 = vmul.f32 %v3293_v38, %v2900_v32  ;;  %v1138_v20 = vadd.f32 %v1106_v1, %v1037_v17  ;;  %v1107_v7 = vmul.f32 %v2926_v51, %v3373_v45  ;;  %v3393_v17 = vld [vmem:[#allocation2 + $0x142] sm:$0xff] }
  0x83   : > { %v938_v26 = vadd.f32 %v906_v10, %v838_v42  ;;  %v899_v37 = vmul.f32 %v3306_v19, %v2903_v33  ;;  %v731_v62 = vadd.f32 %v699_v16, %v631_v11  ;;  %v500_v46 = vmul.f32 %v3205_v60, %v2869_v12 }
  0x84   : > { %v1370_v58 = vadd.f32 %v2978_v56, %v1331_v29  ;;  %v600_v40 = vmul.f32 %v3220_v18, %v2872_v13  ;;  %v1238_v57 = vadd.f32 %v1206_v22, %v1138_v20  ;;  %v1207_v10 = vmul.f32 %v2929_v52, %v3382_v54 }
  0x85   : > { %v1038_v1 = vadd.f32 %v1006_v8, %v938_v26  ;;  %v700_v59 = vmul.f32 %v3233_v31, %v2875_v14  ;;  %v831_v42 = vadd.f32 %v799_v2, %v731_v62  ;;  %v999_v16 = vmul.f32 %v3314_v35, %v2917_v43 }
  0x86   : > { %2617 = vmatmul.mubr.msk.f32.gmra.mrb[14].mxu0 %vm365_vm0, %v1370_v58  ;;  %v632_v60 = vadd.f32 %v600_v40, %v500_v46  ;;  %v800_v18 = vmul.f32 %v3321_v61, %v2900_v32  ;;  %v1338_v22 = vadd.f32 %v1306_v55, %v1238_v57  ;;  %v1307_v29 = vmul.f32 %v2932_v53, %v3393_v17 }
  0x87   : > { %v1139_v8 = vadd.f32 %v1107_v7, %v1038_v1  ;;  %v1100_v31 = vmul.f32 %v2926_v51, %v3162_v41  ;;  %v931_v11 = vadd.f32 %v899_v37, %v831_v42  ;;  %v900_v2 = vmul.f32 %v3330_v30, %v2903_v33 }
  0x88   : > { %v732_v20 = vadd.f32 %v700_v59, %v632_v60  ;;  %v507_v26 = vmul.f32 %v3237_v36, %v2869_v12  ;;  %v1377_v58 = vadd.f32 %v2978_v56, %v1338_v22  ;;  %v607_v55 = vmul.f32 %v3252_v50, %v2872_v13  ;;  %v3426_v22 = vld [vmem:[#allocation2 + $0x150] sm:$0xff] }
  0x89   : > { %v1239_v62 = vadd.f32 %v1207_v10, %v1139_v8  ;;  %v707_v7 = vmul.f32 %v3262_v0, %v2875_v14  ;;  %v1031_v46 = vadd.f32 %v999_v16, %v931_v11  ;;  %v1200_v37 = vmul.f32 %v2929_v52, %v3171_v23 }
  0x8a   : > { %v832_v40 = vadd.f32 %v800_v18, %v732_v20  ;;  %v1000_v57 = vmul.f32 %v3341_v47, %v2917_v43  ;;  %2628 = vmatprep.mubr.msk.f32.mxu1 %vm365_vm0, %v1377_v58  ;;  %v1300_v1 = vmul.f32 %v2932_v53, %v3173_v28  ;;  %v639_v10 = vadd.f32 %v607_v55, %v507_v26 }
  0x8b   : > { %v1339_v36 = vadd.f32 %v1307_v29, %v1239_v62  ;;  %v807_v50 = vmul.f32 %v3345_v49, %v2900_v32  ;;  %v1132_v59 = vadd.f32 %v1100_v31, %v1031_v46  ;;  %v1101_v42 = vmul.f32 %v2926_v51, %v3198_v15 }
  0x8c   : > { %v932_v0 = vadd.f32 %v900_v2, %v832_v40  ;;  %v907_v16 = vmul.f32 %v3358_v6, %v2903_v33  ;;  %v739_v18 = vadd.f32 %v707_v7, %v639_v10  ;;  %v508_v8 = vmul.f32 %v3269_v48, %v2869_v12 }
  0x8d   : > { %v1378_v60 = vadd.f32 %v2978_v56, %v1339_v36  ;;  %v608_v29 = vmul.f32 %v3278_v44, %v2872_v13  ;;  %v1232_v11 = vadd.f32 %v1200_v37, %v1132_v59  ;;  %v1201_v20 = vmul.f32 %v2929_v52, %v3200_v25 }
  0x8e   : > { %v1032_v31 = vadd.f32 %v1000_v57, %v932_v0  ;;  %v708_v2 = vmul.f32 %v3289_v3, %v2875_v14  ;;  %v839_v26 = vadd.f32 %v807_v50, %v739_v18  ;;  %v1007_v58 = vmul.f32 %v3366_v21, %v2917_v43  ;;  %v3450_v50 = vld [vmem:[#allocation2 + $0x151] sm:$0xff] }
  0x8f   : > { %2629 = vmatmul.mubr.msk.f32.gmra.mrb[2].mxu1 %vm365_vm0, %v1378_v60  ;;  %v640_v62 = vadd.f32 %v608_v29, %v508_v8  ;;  %v808_v48 = vmul.f32 %v3373_v45, %v2900_v32  ;;  %v1332_v55 = vadd.f32 %v1300_v1, %v1232_v11  ;;  %v1301_v7 = vmul.f32 %v2932_v53, %v3211_v9  ;;  %v3452_v1 = vld [vmem:[#allocation2 + $0x158] sm:$0xff] }
  0x90   : > { %v1133_v44 = vadd.f32 %v1101_v42, %v1032_v31  ;;  %v1108_v46 = vmul.f32 %v2926_v51, %v3426_v22  ;;  %v939_v37 = vadd.f32 %v907_v16, %v839_v26  ;;  %v908_v40 = vmul.f32 %v3382_v54, %v2903_v33  ;;  %v3460_v60 = vld [vmem:[#allocation2 + $0x152] sm:$0xff] }
  0x91   : > { %v740_v3 = vadd.f32 %v708_v2, %v640_v62  ;;  %v501_v57 = vmul.f32 %v3293_v38, %v2869_v12  ;;  %v1371_v36 = vadd.f32 %v2978_v56, %v1332_v55  ;;  %v601_v59 = vmul.f32 %v3306_v19, %v2872_v13 }
  0x92   : > { %v1233_v10 = vadd.f32 %v1201_v20, %v1133_v44  ;;  %v701_v0 = vmul.f32 %v3314_v35, %v2875_v14  ;;  %v1039_v42 = vadd.f32 %v1007_v58, %v939_v37  ;;  %v1208_v16 = vmul.f32 %v2929_v52, %v3450_v50  ;;  %v3474_v58 = vld [vmem:[#allocation2 + $0x159] sm:$0xff] }
  0x93   : > { %v840_v38 = vadd.f32 %v808_v48, %v740_v3  ;;  %v1008_v18 = vmul.f32 %v3393_v17, %v2917_v43  ;;  %2619 = vmatprep.mubr.msk.f32.mxu0 %vm365_vm0, %v1371_v36  ;;  %v1308_v29 = vmul.f32 %v2932_v53, %v3460_v60  ;;  %v633_v19 = vadd.f32 %v601_v59, %v501_v57 }
  0x94   : > { %v1333_v8 = vadd.f32 %v1301_v7, %v1233_v10  ;;  %v801_v35 = vmul.f32 %v2900_v32, %v3162_v41  ;;  %v1140_v11 = vadd.f32 %v1108_v46, %v1039_v42  ;;  %v1109_v20 = vmul.f32 %v2926_v51, %v3452_v1 }
  0x95   : > { %v940_v31 = vadd.f32 %v908_v40, %v840_v38  ;;  %v901_v2 = vmul.f32 %v2903_v33, %v3171_v23  ;;  %v733_v62 = vadd.f32 %v701_v0, %v633_v19  ;;  %v502_v48 = vmul.f32 %v3321_v61, %v2869_v12 }
  0x96   : > { %v1372_v26 = vadd.f32 %v2978_v56, %v1333_v8  ;;  %v602_v55 = vmul.f32 %v3330_v30, %v2872_v13  ;;  %v1240_v41 = vadd.f32 %v1208_v16, %v1140_v11  ;;  %v1209_v7 = vmul.f32 %v2929_v52, %v3474_v58  ;;  %v3485_v56 = vld [vmem:[#allocation2 + $0x15a] sm:$0xff] }
  0x97   : > { %v1040_v44 = vadd.f32 %v1008_v18, %v940_v31  ;;  %v702_v46 = vmul.f32 %v3341_v47, %v2875_v14  ;;  %v833_v23 = vadd.f32 %v801_v35, %v733_v62  ;;  %v1001_v37 = vmul.f32 %v2917_v43, %v3173_v28 }
  0x98   : > { %2620 = vmatmul.mubr.msk.f32.gmra.mrb[16].mxu0 %vm365_vm0, %v1372_v26  ;;  %v634_v61 = vadd.f32 %v602_v55, %v502_v48  ;;  %v802_v30 = vmul.f32 %v2900_v32, %v3198_v15  ;;  %v1340_v3 = vadd.f32 %v1308_v29, %v1240_v41  ;;  %v1309_v57 = vmul.f32 %v2932_v53, %v3485_v56  ;;  %v3502_v15 = vld [vmem:[%s3867_s2] ss:$0 sm:$0xff]  ;;  %v1074_v41 = vld [vmem:[#allocation2 + $0x168] sm:$0xff] }
  0x99   : > { %v1141_v40 = vadd.f32 %v1109_v20, %v1040_v44  ;;  %v1102_v47 = vmul.f32 %v2926_v51, %v3183_v39  ;;  %v933_v36 = vadd.f32 %v901_v2, %v833_v23  ;;  %v902_v59 = vmul.f32 %v2903_v33, %v3200_v25 }
  0x9a   : > { %v734_v10 = vadd.f32 %v702_v46, %v634_v61  ;;  %v509_v28 = vmul.f32 %v3345_v49, %v2869_v12  ;;  %v1379_v0 = vadd.f32 %v3502_v15, %v1340_v3  ;;  %v609_v16 = vmul.f32 %v3358_v6, %v2872_v13 }
  0x9b   : > { %v1241_v42 = vadd.f32 %v1209_v7, %v1141_v40  ;;  %v709_v39 = vmul.f32 %v3366_v21, %v2875_v14  ;;  %v1033_v38 = vadd.f32 %v1001_v37, %v933_v36  ;;  %v1202_v25 = vmul.f32 %v2929_v52, %v3209_v4  ;;  %v1174_v40 = vld [vmem:[#allocation2 + $0x169] sm:$0xff] }
  0x9c   : > { %v834_v18 = vadd.f32 %v802_v30, %v734_v10  ;;  %v1002_v49 = vmul.f32 %v2917_v43, %v3211_v9  ;;  %2631 = vmatprep.mubr.msk.f32.mxu1 %vm365_vm0, %v1379_v0  ;;  %v1302_v29 = vmul.f32 %v2932_v53, %v3228_v27  ;;  %v641_v19 = vadd.f32 %v609_v16, %v509_v28  ;;  %v1274_v10 = vld [vmem:[#allocation2 + $0x16a] sm:$0xff] }
  0x9d   : > { %v1341_v8 = vadd.f32 %v1309_v57, %v1241_v42  ;;  %v809_v6 = vmul.f32 %v3426_v22, %v2900_v32  ;;  %v1134_v35 = vadd.f32 %v1102_v47, %v1033_v38  ;;  %v1103_v11 = vmul.f32 %v2926_v51, %v3217_v34  ;;  %v1075_v42 = vld [vmem:[#allocation2 + $0x170] sm:$0xff] }
  0x9e   : > { %v934_v21 = vadd.f32 %v902_v59, %v834_v18  ;;  %v909_v4 = vmul.f32 %v3450_v50, %v2903_v33  ;;  %v741_v31 = vadd.f32 %v709_v39, %v641_v19  ;;  %v510_v20 = vmul.f32 %v3373_v45, %v2869_v12 }
  0x9f   : > { %v1380_v9 = vadd.f32 %v3502_v15, %v1341_v8  ;;  %v610_v27 = vmul.f32 %v3382_v54, %v2872_v13  ;;  %v1234_v2 = vadd.f32 %v1202_v25, %v1134_v35  ;;  %v1203_v62 = vmul.f32 %v2929_v52, %v3245_v24 }
  0xa0   : > { %v1034_v26 = vadd.f32 %v1002_v49, %v934_v21  ;;  %v710_v34 = vmul.f32 %v3393_v17, %v2875_v14  ;;  %v841_v48 = vadd.f32 %v809_v6, %v741_v31  ;;  %v1009_v55 = vmul.f32 %v3460_v60, %v2917_v43  ;;  %v1175_v49 = vld [vmem:[#allocation2 + $0x171] sm:$0xff] }
  0xa1   : > { %2632 = vmatmul.mubr.msk.f32.gmra.mrb[4].mxu1 %vm365_vm0, %v1380_v9  ;;  %v642_v44 = vadd.f32 %v610_v27, %v510_v20  ;;  %v810_v45 = vmul.f32 %v3452_v1, %v2900_v32  ;;  %v1334_v54 = vadd.f32 %v1302_v29, %v1234_v2  ;;  %v1303_v46 = vmul.f32 %v2932_v53, %v3254_v63  ;;  %v1076_v29 = vld [vmem:[#allocation2 + $0x180] sm:$0xff]  ;;  %v1275_v9 = vld [vmem:[#allocation2 + $0x172] sm:$0xff] }
  0xa2   : > { %v1135_v7 = vadd.f32 %v1103_v11, %v1034_v26  ;;  %v1110_v24 = vmul.f32 %v2926_v51, %v1074_v41  ;;  %v941_v23 = vadd.f32 %v909_v4, %v841_v48  ;;  %v910_v37 = vmul.f32 %v3474_v58, %v2903_v33 }
  0xa3   : > { %v742_v17 = vadd.f32 %v710_v34, %v642_v44  ;;  %v511_v61 = vmul.f32 %v3426_v22, %v2869_v12  ;;  %v1373_v30 = vadd.f32 %v3502_v15, %v1334_v54  ;;  %v611_v57 = vmul.f32 %v3450_v50, %v2872_v13  ;;  %v1176_v34 = vld [vmem:[#allocation2 + $0x181] sm:$0xff] }
  0xa4   : > { %v1235_v3 = vadd.f32 %v1203_v62, %v1135_v7  ;;  %v711_v63 = vmul.f32 %v3460_v60, %v2875_v14  ;;  %v1041_v47 = vadd.f32 %v1009_v55, %v941_v23  ;;  %v1210_v36 = vmul.f32 %v2929_v52, %v1174_v40  ;;  %v1276_v55 = vld [vmem:[#allocation2 + $0x182] sm:$0xff] }
  0xa5   : > { %v842_v59 = vadd.f32 %v810_v45, %v742_v17  ;;  %v1010_v28 = vmul.f32 %v3485_v56, %v2917_v43  ;;  %2622 = vmatprep.mubr.msk.f32.mxu0 %vm365_vm0, %v1373_v30  ;;  %v1310_v0 = vmul.f32 %v2932_v53, %v1274_v10  ;;  %v643_v16 = vadd.f32 %v611_v57, %v511_v61 }
  0xa6   : > { %v1335_v22 = vadd.f32 %v1303_v46, %v1235_v3  ;;  %v811_v50 = vmul.f32 %v1074_v41, %v2900_v32  ;;  %v1142_v39 = vadd.f32 %v1110_v24, %v1041_v47  ;;  %v1111_v60 = vmul.f32 %v2926_v51, %v1075_v42  ;;  %v1077_v46 = vld [vmem:[#allocation2 + $0x188] sm:$0xff] }
  0xa7   : > { %v942_v38 = vadd.f32 %v910_v37, %v842_v59  ;;  %v911_v25 = vmul.f32 %v1174_v40, %v2903_v33  ;;  %v743_v8 = vadd.f32 %v711_v63, %v643_v16  ;;  %v512_v19 = vmul.f32 %v3452_v1, %v2869_v12  ;;  %v1078_v16 = vld [vmem:[#allocation2 + $0x198] sm:$0xff] }
  0xa8   : > { %v1374_v18 = vadd.f32 %v3502_v15, %v1335_v22  ;;  %v612_v6 = vmul.f32 %v3474_v58, %v2872_v13  ;;  %v1242_v35 = vadd.f32 %v1210_v36, %v1142_v39  ;;  %v1211_v11 = vmul.f32 %v2929_v52, %v1175_v49  ;;  %v1277_v22 = vld [vmem:[#allocation2 + $0x18a] sm:$0xff] }
  0xa9   : > { %v1042_v21 = vadd.f32 %v1010_v28, %v942_v38  ;;  %v712_v4 = vmul.f32 %v3485_v56, %v2875_v14  ;;  %v843_v31 = vadd.f32 %v811_v50, %v743_v8  ;;  %v1011_v20 = vmul.f32 %v1274_v10, %v2917_v43 }
  0xaa   : > { %2623 = vmatmul.mubr.msk.f32.gmra.mrb[18].mxu0 %vm365_vm0, %v1374_v18  ;;  %v644_v27 = vadd.f32 %v612_v6, %v512_v19  ;;  %v812_v2 = vmul.f32 %v1075_v42, %v2900_v32  ;;  %v1342_v1 = vadd.f32 %v1310_v0, %v1242_v35  ;;  %v1311_v58 = vmul.f32 %v2932_v53, %v1275_v9 }
  0xab   : > { %v1143_v26 = vadd.f32 %v1111_v60, %v1042_v21  ;;  %v1112_v62 = vmul.f32 %v2926_v51, %v1076_v29  ;;  %v943_v48 = vadd.f32 %v911_v25, %v843_v31  ;;  %v912_v56 = vmul.f32 %v1175_v49, %v2903_v33  ;;  %v1278_v31 = vld [vmem:[#allocation2 + $0x19a] sm:$0xff] }
  0xac   : > { %v744_v44 = vadd.f32 %v712_v4, %v644_v27  ;;  %v513_v45 = vmul.f32 %v1074_v41, %v2869_v12  ;;  %v1381_v54 = vadd.f32 %v3502_v15, %v1342_v1  ;;  %v613_v24 = vmul.f32 %v1174_v40, %v2872_v13  ;;  %v1177_v41 = vld [vmem:[#allocation2 + $0x189] sm:$0xff] }
  0xad   : > { %v1243_v7 = vadd.f32 %v1211_v11, %v1143_v26  ;;  %v713_v23 = vmul.f32 %v1274_v10, %v2875_v14  ;;  %v1043_v17 = vadd.f32 %v1011_v20, %v943_v48  ;;  %v1212_v37 = vmul.f32 %v2929_v52, %v1176_v34  ;;  %v1079_v20 = vld [vmem:[#allocation2 + $0x1a0] sm:$0xff] }
  0xae   : > { %v844_v61 = vadd.f32 %v812_v2, %v744_v44  ;;  %v1012_v30 = vmul.f32 %v1275_v9, %v2917_v43  ;;  %2634 = vmatprep.mubr.msk.f32.mxu1 %vm365_vm0, %v1381_v54  ;;  %v1312_v57 = vmul.f32 %v2932_v53, %v1276_v55  ;;  %v645_v63 = vadd.f32 %v613_v24, %v513_v45  ;;  %v1279_v44 = vld [vmem:[#allocation2 + $0x1a2] sm:$0xff] }
  0xaf   : > { %v1343_v3 = vadd.f32 %v1311_v58, %v1243_v7  ;;  %v813_v47 = vmul.f32 %v1076_v29, %v2900_v32  ;;  %v1144_v36 = vadd.f32 %v1112_v62, %v1043_v17  ;;  %v1113_v40 = vmul.f32 %v2926_v51, %v1077_v46 }
  0xb0   : > { %v944_v59 = vadd.f32 %v912_v56, %v844_v61  ;;  %v913_v10 = vmul.f32 %v1176_v34, %v2903_v33  ;;  %v745_v0 = vadd.f32 %v713_v23, %v645_v63  ;;  %v514_v50 = vmul.f32 %v1075_v42, %v2869_v12  ;;  %v1178_v42 = vld [vmem:[#allocation2 + $0x199] sm:$0xff] }
  0xb1   : > { %v1382_v28 = vadd.f32 %v3502_v15, %v1343_v3  ;;  %v614_v39 = vmul.f32 %v1175_v49, %v2872_v13  ;;  %v1244_v38 = vadd.f32 %v1212_v37, %v1144_v36  ;;  %v1213_v25 = vmul.f32 %v2929_v52, %v1177_v41 }
  0xb2   : > { %v1044_v60 = vadd.f32 %v1012_v30, %v944_v59  ;;  %v714_v18 = vmul.f32 %v1275_v9, %v2875_v14  ;;  %v845_v8 = vadd.f32 %v813_v47, %v745_v0  ;;  %v1013_v29 = vmul.f32 %v1276_v55, %v2917_v43  ;;  %v2218_v30 = vld [vmem:[%s3872_s7 + $0x18] sm:$0xff] }
  0xb3   : > { %2635 = vmatmul.mubr.msk.f32.gmra.mrb[6].mxu1 %vm365_vm0, %v1382_v28  ;;  %v646_v19 = vadd.f32 %v614_v39, %v514_v50  ;;  %v814_v6 = vmul.f32 %v1077_v46, %v2900_v32  ;;  %v1344_v35 = vadd.f32 %v1312_v57, %v1244_v38  ;;  %v1313_v12 = vmul.f32 %v2932_v53, %v1277_v22  ;;  %v3660_v57 = vld [vmem:[%s3869_s4] ss:$0 sm:$0xff] }
  0xb4   : > { %v1145_v21 = vadd.f32 %v1113_v40, %v1044_v60  ;;  %v1114_v13 = vmul.f32 %v2926_v51, %v1078_v16  ;;  %v945_v49 = vadd.f32 %v913_v10, %v845_v8  ;;  %v914_v4 = vmul.f32 %v1177_v41, %v2903_v33  ;;  %v1859_v41 = vld [vmem:[%s3870_s5] sm:$0x7] }
  0xb5   : > { %v746_v11 = vadd.f32 %v714_v18, %v646_v19  ;;  %v1383_v14 = vadd.f32 %v3502_v15, %v1344_v35  ;;  %v3884_v27 = vmov 0.0   ;;  %v1214_v2 = vmul.f32 %v2929_v52, %v1178_v42  ;;  %v3885_v10 = vld [vmem:[#allocation4_spill] sm:$0xff]  ;;  %v3886_v18 = vld [vmem:[#allocation5_spill] sm:$0xff] }
  0xb6   : > { %v1245_v9 = vadd.f32 %v1213_v25, %v1145_v21  ;;  %1781 = vst.msk [vmem:[#allocation3] sm:$0xff] %vm1780_vm3, %v3884_v27  ;;  %1782 = vst.msk [vmem:[#allocation3 + $0x8] sm:$0xff] %vm1780_vm3, %v3884_v27  ;;  %v1045_v32 = vadd.f32 %v1013_v29, %v945_v49  ;;  %v1014_v26 = vmul.f32 %v1277_v22, %v2917_v43  ;;  %v1179_v43 = vld [vmem:[#allocation2 + $0x1a1] sm:$0xff] }
  0xb7   : > { %v846_v1 = vadd.f32 %v814_v6, %v746_v11  ;;  %1792 = vst.msk [vmem:[#allocation3 + $0x30] sm:$0x1] %vm1789_vm4, %v3884_v27  ;;  %1790 = vst.msk [vmem:[#allocation3] sm:$0x1] %vm1789_vm4, %v3884_v27  ;;  %2637 = vmatprep.mubr.msk.f32.mxu1 %vm365_vm0, %v1383_v14  ;;  %v1314_v62 = vmul.f32 %v2932_v53, %v1278_v31  ;;  %v1115_v48 = vmul.f32 %v2926_v51, %v1079_v20  ;;  %v1860_v6 = vld [vmem:[%s3870_s5 + $0x4] sm:$0x7] }
  0xb8   : > { %1791 = vst.msk [vmem:[#allocation3 + $0x18] sm:$0x1] %vm1789_vm4, %v3884_v27  ;;  %1793 = vst.msk [vmem:[#allocation3 + $0x48] sm:$0x1] %vm1789_vm4, %v3884_v27  ;;  %v1345_v33 = vadd.f32 %v1313_v12, %v1245_v9  ;;  %v1146_v58 = vadd.f32 %v1114_v13, %v1045_v32  ;;  %v1215_v54 = vmul.f32 %v2929_v52, %v1179_v43  ;;  %v2215_v52 = vld [vmem:[%s3872_s7] sm:$0xff] }
  0xb9   : > { %1794 = vst.msk [vmem:[#allocation3 + $0x60] sm:$0x1] %vm1789_vm4, %v3884_v27  ;;  %1795 = vst.msk [vmem:[#allocation3 + $0x78] sm:$0x1] %vm1789_vm4, %v3884_v27  ;;  %v946_v34 = vadd.f32 %v914_v4, %v846_v1  ;;  %v1315_v24 = vmul.f32 %v2932_v53, %v1279_v44  ;;  %v2216_v53 = vld [vmem:[%s3872_s7 + $0x8] sm:$0xff]  ;;  %v3668_v40 = vrot.slane %v1859_v41, %v2847_v5 }
  0xba   : > { %1796 = vst.msk [vmem:[#allocation3 + $0x90] sm:$0x1] %vm1789_vm4, %v3884_v27  ;;  %1797 = vst.msk [vmem:[#allocation3 + $0xa8] sm:$0x1] %vm1789_vm4, %v3884_v27  ;;  %v1384_v55 = vadd.f32 %v3502_v15, %v1345_v33  ;;  %v1246_v56 = vadd.f32 %v1214_v2, %v1146_v58  ;;  %v2663_v61 = vpack.c.bf16 %v2216_v53, %v2215_v52 }
  0xbb   : > { %1798 = vst.msk [vmem:[#allocation3 + $0xc0] sm:$0x1] %vm1789_vm4, %v3884_v27  ;;  %1799 = vst.msk [vmem:[#allocation3 + $0xd8] sm:$0x1] %vm1789_vm4, %v3884_v27  ;;  %v1046_v45 = vadd.f32 %v1014_v26, %v946_v34  ;;  %v3671_v28 = vrot.slane %v1859_v41, %v3885_v10  ;;  %v3676_v8 = vrot.slane %v1859_v41, %v3886_v18  ;;  %v1861_v34 = vld [vmem:[%s3870_s5 + $0x8] sm:$0x7] }
  0xbc   : > { %1800 = vst.msk [vmem:[#allocation3 + $0xf0] sm:$0x1] %vm1789_vm4, %v3884_v27  ;;  %1801 = vst.msk [vmem:[#allocation3 + $0x108] sm:$0x1] %vm1789_vm4, %v3884_v27  ;;  %2638 = vmatmul.mubr.msk.f32.gmra.mrb[8].mxu1 %vm365_vm0, %v1384_v55  ;;  %v1346_v7 = vadd.f32 %v1314_v62, %v1246_v56  ;;  %2664 = vmatprep.subr.bf16.mxu1 %v2663_v61  ;;  %v3687_v11 = vrot.slane %v1860_v6, %v2847_v5 }
  0xbd   : > { %1802 = vst.msk [vmem:[#allocation3 + $0x120] sm:$0x1] %vm1789_vm4, %v3884_v27  ;;  %1803 = vst.msk [vmem:[#allocation3 + $0x138] sm:$0x1] %vm1789_vm4, %v3884_v27  ;;  %v1147_v46 = vadd.f32 %v1115_v48, %v1046_v45  ;;  %2666 = vmatpush3.bf16.msra.mxu1 %v2663_v61  ;;  %v1898_v16 = vld [vmem:[#allocation3 + $0x1] ss:$2 sm:$0xff]  ;;  %v3690_v31 = vrot.slane %v1860_v6, %v3885_v10  ;;  %v3697_v43 = vrot.slane %v1860_v6, %v3886_v18 }
  0xbe   : > { %1804 = vst.msk [vmem:[#allocation3 + $0x150] sm:$0x1] %vm1789_vm4, %v3884_v27  ;;  %1805 = vst.msk [vmem:[#allocation3 + $0x168] sm:$0x1] %vm1789_vm4, %v3884_v27  ;;  %v1385_v23 = vadd.f32 %v3502_v15, %v1346_v7  ;;  %v1862_v0 = vld [vmem:[#allocation3] ss:$2 sm:$0xff]  ;;  %v1917_v25 = vmul.f32 %v3671_v28, %v1898_v16  ;;  %v3706_v7 = vrot.slane %v1861_v34, %v2847_v5 }
  0xbf   : > { %1806 = vst.msk [vmem:[#allocation3 + $0x180] sm:$0x1] %vm1789_vm4, %v3884_v27  ;;  %v1247_v17 = vadd.f32 %v1215_v54, %v1147_v46  ;;  %v1881_v60 = vmul.f32 %v3668_v40, %v1862_v0 }
  0xc0   : > { %2640 = vmatprep.mubr.msk.f32.mxu1 %vm365_vm0, %v1385_v23  ;;  %1784 = vst.msk [vmem:[#allocation3 + $0x10] sm:$0x3] %vm1783_vm5, %v3884_v27 }
  0xc1   : > { %v1347_v37 = vadd.f32 %v1315_v24, %v1247_v17  ;;  %v1925_v12 = vadd.f32 %v1917_v25, %v1881_v60  ;;  %v3727_v60 = vld [vmem:[%s3871_s6] ss:$0 sm:$0xff] }
  0xc3   : > { %v1386_v51 = vadd.f32 %v3502_v15, %v1347_v37  ;;  %v2217_v15 = vld [vmem:[%s3872_s7 + $0x10] sm:$0xff] }
  0xc4   : > { %v2667_v3 = vpack.c.bf16 %v2218_v30, %v2217_v15  ;;  %v3717_v30 = vrot.slane %v1861_v34, %v3886_v18 }
  0xc5   : > { %2641 = vmatmul.mubr.msk.f32.gmra.mrb[10].mxu1 %vm365_vm0, %v1386_v51  ;;  %v3709_v51 = vrot.slane %v1861_v34, %v3885_v10 }
  0xc6   : > { %2668 = vmatprep.subr.bf16.mxu1 %v2667_v3 }
  0xc7   : > { %2670 = vmatpush3.bf16.msra.mxu1 %v2667_v3  ;;  %v1934_v29 = vld [vmem:[#allocation3 + $0x2] ss:$2 sm:$0xff] }
  0xc8   : > { %v1953_v13 = vmul.f32 %v3676_v8, %v1934_v29 }
  0xca   : > { %v1961_v9 = vadd.f32 %v1953_v13, %v1925_v12 }
 0x110   : > { %v2597_v63 = vpop.f32.mrb[0].mxu0 }
 0x111   : > { %v1563_v47 = vadd.f32 %v2597_v63, %v3660_v57  ;;  %v1557_v36 = vpop.f32.mrb[1].mxu0 }
 0x112   : > { %v1558_v59 = vadd.f32 %v3660_v57, %v1557_v36 }
 0x113   : > { %v1717_v22 = vmax.f32 %v1563_v47, 0.0 }
 0x114   : > { %v1716_v50 = vmax.f32 %v1558_v59, 0.0 }
 0x115   : > { %v1749_v39 = vmin.f32 %v1717_v22, 6.0 }
 0x116   : > { %v1748_v38 = vmin.f32 %v1716_v50, 6.0 }
 0x117   : > { %1828 = vst.msk [vmem:[#allocation3 + $0x21] sm:$0xff] %vm1780_vm3, %v1749_v39 }
 0x118   : > { %1827 = vst.msk [vmem:[#allocation3 + $0x19] sm:$0xff] %vm1780_vm3, %v1748_v38 }
 0x11a   : > { %v2600_v19 = vpop.f32.mrb[2].mxu0 }
 0x11b   : > { %v1573_v35 = vadd.f32 %v2600_v19, %v3660_v57  ;;  %v1567_v21 = vpop.f32.mrb[3].mxu0 }
 0x11c   : > { %v1568_v42 = vadd.f32 %v3660_v57, %v1567_v21 }
 0x11d   : > { %v1719_v49 = vmax.f32 %v1573_v35, 0.0 }
 0x11e   : > { %v1718_v4 = vmax.f32 %v1568_v42, 0.0 }
 0x11f   : > { %v1751_v14 = vmin.f32 %v1719_v49, 6.0  ;;  %v1969_v27 = vld [vmem:[#allocation3 + $0x18] ss:$2 sm:$0xff]  ;;  %v2005_v32 = vld [vmem:[#allocation3 + $0x19] ss:$2 sm:$0xff] }
 0x120   : > { %v1750_v20 = vmin.f32 %v1718_v4, 6.0  ;;  %v1988_v2 = vmul.f32 %v3687_v11, %v1969_v27  ;;  %v2024_v33 = vmul.f32 %v3690_v31, %v2005_v32  ;;  %v2041_v48 = vld [vmem:[#allocation3 + $0x1a] ss:$2 sm:$0xff] }
 0x121   : > { %1830 = vst.msk [vmem:[#allocation3 + $0x39] sm:$0xff] %vm1780_vm3, %v1751_v14  ;;  %v2060_v54 = vmul.f32 %v3697_v43, %v2041_v48 }
 0x122   : > { %1829 = vst.msk [vmem:[#allocation3 + $0x31] sm:$0xff] %vm1780_vm3, %v1750_v20  ;;  %v1996_v26 = vadd.f32 %v1988_v2, %v1961_v9 }
 0x123   : > { %v2603_v1 = vpop.f32.mrb[4].mxu0 }
 0x124   : > { %v1583_v58 = vadd.f32 %v2603_v1, %v3660_v57  ;;  %v1577_v62 = vpop.f32.mrb[5].mxu0  ;;  %v2032_v44 = vadd.f32 %v2024_v33, %v1996_v26 }
 0x125   : > { %v1578_v55 = vadd.f32 %v3660_v57, %v1577_v62 }
 0x126   : > { %v1721_v56 = vmax.f32 %v1583_v58, 0.0  ;;  %v2068_v37 = vadd.f32 %v2060_v54, %v2032_v44 }
 0x127   : > { %v1720_v45 = vmax.f32 %v1578_v55, 0.0 }
 0x128   : > { %v1753_v46 = vmin.f32 %v1721_v56, 6.0 }
 0x129   : > { %v1864_v24 = vld [vmem:[#allocation3 + $0x30] ss:$2 sm:$0xff]  ;;  %v1900_v23 = vld [vmem:[#allocation3 + $0x31] ss:$2 sm:$0xff]  ;;  %v1752_v17 = vmin.f32 %v1720_v45, 6.0 }
 0x12a   : > { %1832 = vst.msk [vmem:[#allocation3 + $0x51] sm:$0xff] %vm1780_vm3, %v1753_v46  ;;  %v2077_v52 = vld [vmem:[#allocation3 + $0x30] ss:$2 sm:$0xff]  ;;  %v2113_v53 = vld [vmem:[#allocation3 + $0x31] ss:$2 sm:$0xff]  ;;  %v1882_v61 = vmul.f32 %v3668_v40, %v1864_v24  ;;  %v1918_v15 = vmul.f32 %v3671_v28, %v1900_v23 }
 0x12b   : > { %1831 = vst.msk [vmem:[#allocation3 + $0x49] sm:$0xff] %vm1780_vm3, %v1752_v17  ;;  %v2096_v5 = vmul.f32 %v3706_v7, %v2077_v52  ;;  %v2149_v3 = vld [vmem:[#allocation3 + $0x32] ss:$2 sm:$0xff]  ;;  %v2132_v36 = vmul.f32 %v3709_v51, %v2113_v53 }
 0x12c   : > { %v1936_v41 = vld [vmem:[#allocation3 + $0x32] ss:$2 sm:$0xff]  ;;  %v2606_v63 = vpop.f32.mrb[6].mxu0  ;;  %v1926_v59 = vadd.f32 %v1918_v15, %v1882_v61  ;;  %v2168_v50 = vmul.f32 %v3717_v30, %v2149_v3 }
 0x12d   : > { %v2104_v47 = vadd.f32 %v2096_v5, %v2068_v37  ;;  %v1593_v10 = vadd.f32 %v2606_v63, %v3660_v57  ;;  %v1587_v22 = vpop.f32.mrb[7].mxu0  ;;  %v1954_v39 = vmul.f32 %v3676_v8, %v1936_v41 }
 0x12e   : > { %v1588_v0 = vadd.f32 %v3660_v57, %v1587_v22 }
 0x12f   : > { %v2140_v16 = vadd.f32 %v2132_v36, %v2104_v47  ;;  %v1723_v38 = vmax.f32 %v1593_v10, 0.0  ;;  %v1962_v29 = vadd.f32 %v1954_v39, %v1926_v59 }
 0x130   : > { %v1722_v25 = vmax.f32 %v1588_v0, 0.0 }
 0x131   : > { %v2176_v18 = vadd.f32 %v2168_v50, %v2140_v16  ;;  %v1755_v19 = vmin.f32 %v1723_v38, 6.0 }
 0x132   : > { %v1971_v6 = vld [vmem:[#allocation3 + $0x48] ss:$2 sm:$0xff]  ;;  %v2007_v35 = vld [vmem:[#allocation3 + $0x49] ss:$2 sm:$0xff]  ;;  %v1754_v21 = vmin.f32 %v1722_v25, 6.0 }
 0x133   : > { %v2191_v12 = vadd.f32 %v3727_v60, %v2176_v18  ;;  %v1989_v13 = vmul.f32 %v3687_v11, %v1971_v6  ;;  %1834 = vst.msk [vmem:[#allocation3 + $0x69] sm:$0xff] %vm1780_vm3, %v1755_v19  ;;  %v2025_v14 = vmul.f32 %v3690_v31, %v2007_v35  ;;  %v2043_v27 = vld [vmem:[#allocation3 + $0x4a] ss:$2 sm:$0xff] }
 0x134   : > { %1833 = vst.msk [vmem:[#allocation3 + $0x61] sm:$0xff] %vm1780_vm3, %v1754_v21  ;;  %v2061_v58 = vmul.f32 %v3697_v43, %v2043_v27 }
 0x135   : > { %v2609_v42 = vpop.f32.mrb[8].mxu0  ;;  %v2199_v49 = vmax.f32 %v2191_v12, 0.0  ;;  %v1997_v4 = vadd.f32 %v1989_v13, %v1962_v29 }
 0x136   : > { %v1603_v9 = vadd.f32 %v2609_v42, %v3660_v57  ;;  %v1597_v20 = vpop.f32.mrb[9].mxu0 }
 0x137   : > { %v1598_v32 = vadd.f32 %v3660_v57, %v1597_v20  ;;  %v2207_v2 = vmin.f32 %v2199_v49, 6.0  ;;  %v2033_v1 = vadd.f32 %v2025_v14, %v1997_v4 }
 0x138   : > { %v1725_v26 = vmax.f32 %v1603_v9, 0.0 }
 0x139   : > { %v1724_v33 = vmax.f32 %v1598_v32, 0.0  ;;  %2651 = vmatprep.mubr.msk.f32.mxu1 %vm1780_vm3, %v2207_v2  ;;  %v2069_v48 = vadd.f32 %v2061_v58, %v2033_v1 }
 0x13a   : > { %v1757_v62 = vmin.f32 %v1725_v26, 6.0 }
 0x13b   : > { %v1756_v34 = vmin.f32 %v1724_v33, 6.0  ;;  %v2079_v55 = vld [vmem:[#allocation3 + $0x60] ss:$2 sm:$0xff]  ;;  %v2115_v44 = vld [vmem:[#allocation3 + $0x61] ss:$2 sm:$0xff] }
 0x13c   : > { %1836 = vst.msk [vmem:[#allocation3 + $0x81] sm:$0xff] %vm1780_vm3, %v1757_v62  ;;  %v2097_v56 = vmul.f32 %v3706_v7, %v2079_v55  ;;  %v1866_v45 = vld [vmem:[#allocation3 + $0x60] ss:$2 sm:$0xff]  ;;  %v1902_v54 = vld [vmem:[#allocation3 + $0x61] ss:$2 sm:$0xff]  ;;  %v2133_v15 = vmul.f32 %v3709_v51, %v2115_v44 }
 0x13d   : > { %1835 = vst.msk [vmem:[#allocation3 + $0x79] sm:$0xff] %vm1780_vm3, %v1756_v34  ;;  %v2612_v46 = vpop.f32.mrb[10].mxu0  ;;  %v2151_v24 = vld [vmem:[#allocation3 + $0x62] ss:$2 sm:$0xff]  ;;  %v1883_v23 = vmul.f32 %v3668_v40, %v1866_v45  ;;  %v1919_v17 = vmul.f32 %v3671_v28, %v1902_v54 }
 0x13e   : > { %v1938_v37 = vld [vmem:[#allocation3 + $0x62] ss:$2 sm:$0xff]  ;;  %v1613_v52 = vadd.f32 %v2612_v46, %v3660_v57  ;;  %v1607_v53 = vpop.f32.mrb[11].mxu0  ;;  %v2105_v61 = vadd.f32 %v2097_v56, %v2069_v48  ;;  %v2169_v47 = vmul.f32 %v3717_v30, %v2151_v24 }
 0x13f   : > { %v1608_v5 = vadd.f32 %v3660_v57, %v1607_v53  ;;  %v1927_v3 = vadd.f32 %v1919_v17, %v1883_v23  ;;  %v1955_v36 = vmul.f32 %v3676_v8, %v1938_v37 }
 0x140   : > { %v1727_v41 = vmax.f32 %v1613_v52, 0.0  ;;  %v2141_v63 = vadd.f32 %v2133_v15, %v2105_v61 }
 0x141   : > { %v1726_v59 = vmax.f32 %v1608_v5, 0.0  ;;  %v1963_v0 = vadd.f32 %v1955_v36, %v1927_v3 }
 0x142   : > { %v1759_v10 = vmin.f32 %v1727_v41, 6.0  ;;  %v2177_v22 = vadd.f32 %v2169_v47, %v2141_v63 }
 0x143   : > { %v1758_v16 = vmin.f32 %v1726_v59, 6.0 }
 0x144   : > { %v1973_v50 = vld [vmem:[#allocation3 + $0x78] ss:$2 sm:$0xff]  ;;  %v2009_v39 = vld [vmem:[#allocation3 + $0x79] ss:$2 sm:$0xff]  ;;  %1838 = vst.msk [vmem:[#allocation3 + $0x99] sm:$0xff] %vm1780_vm3, %v1759_v10  ;;  %v2192_v38 = vadd.f32 %v3727_v60, %v2177_v22 }
 0x145   : > { %v1990_v25 = vmul.f32 %v3687_v11, %v1973_v50  ;;  %1837 = vst.msk [vmem:[#allocation3 + $0x91] sm:$0xff] %vm1780_vm3, %v1758_v16  ;;  %v2026_v6 = vmul.f32 %v3690_v31, %v2009_v39  ;;  %v2045_v35 = vld [vmem:[#allocation3 + $0x7a] ss:$2 sm:$0xff] }
 0x146   : > { %v2200_v29 = vmax.f32 %v2192_v38, 0.0  ;;  %v2062_v14 = vmul.f32 %v3697_v43, %v2045_v35 }
 0x147   : > { %v2615_v18 = vpop.f32.mrb[12].mxu0  ;;  %v1998_v19 = vadd.f32 %v1990_v25, %v1963_v0 }
 0x148   : > { %v1623_v21 = vadd.f32 %v2615_v18, %v3660_v57  ;;  %v1617_v12 = vpop.f32.mrb[13].mxu0  ;;  %v2208_v42 = vmin.f32 %v2200_v29, 6.0 }
 0x149   : > { %v1618_v13 = vadd.f32 %v3660_v57, %v1617_v12  ;;  %v2034_v49 = vadd.f32 %v2026_v6, %v1998_v19 }
 0x14a   : > { %v1729_v4 = vmax.f32 %v1623_v21, 0.0  ;;  %2652 = vmatmul.mubr.msk.f32.vlgmr.msra.gmra.mrb[12].mxu1 %vm1780_vm3, %v2208_v42 }
 0x14b   : > { %v1728_v9 = vmax.f32 %v1618_v13, 0.0  ;;  %v2070_v27 = vadd.f32 %v2062_v14, %v2034_v49 }
 0x14c   : > { %v1761_v20 = vmin.f32 %v1729_v4, 6.0  ;;  %v2081_v2 = vld [vmem:[#allocation3 + $0x90] ss:$2 sm:$0xff]  ;;  %v2117_v1 = vld [vmem:[#allocation3 + $0x91] ss:$2 sm:$0xff] }
 0x14d   : > { %v1760_v32 = vmin.f32 %v1728_v9, 6.0  ;;  %v2098_v26 = vmul.f32 %v3706_v7, %v2081_v2  ;;  %v2153_v33 = vld [vmem:[#allocation3 + $0x92] ss:$2 sm:$0xff]  ;;  %v2134_v34 = vmul.f32 %v3709_v51, %v2117_v1  ;;  %v1904_v55 = vld [vmem:[#allocation3 + $0x91] ss:$2 sm:$0xff] }
 0x14e   : > { %1840 = vst.msk [vmem:[#allocation3 + $0xb1] sm:$0xff] %vm1780_vm3, %v1761_v20  ;;  %v1868_v48 = vld [vmem:[#allocation3 + $0x90] ss:$2 sm:$0xff]  ;;  %v2170_v46 = vmul.f32 %v3717_v30, %v2153_v33  ;;  %v1920_v17 = vmul.f32 %v3671_v28, %v1904_v55 }
 0x14f   : > { %1839 = vst.msk [vmem:[#allocation3 + $0xa9] sm:$0xff] %vm1780_vm3, %v1760_v32  ;;  %v2106_v62 = vadd.f32 %v2098_v26, %v2070_v27  ;;  %v1884_v23 = vmul.f32 %v3668_v40, %v1868_v48  ;;  %v1940_v5 = vld [vmem:[#allocation3 + $0x92] ss:$2 sm:$0xff] }
 0x150   : > { %v2627_v58 = vpop.f32.mrb[0].mxu1  ;;  %v1956_v36 = vmul.f32 %v3676_v8, %v1940_v5 }
 0x151   : > { %v1663_v44 = vadd.f32 %v2627_v58, %v3660_v57  ;;  %v1657_v56 = vpop.f32.mrb[1].mxu1  ;;  %v2142_v54 = vadd.f32 %v2134_v34, %v2106_v62  ;;  %v1928_v3 = vadd.f32 %v1920_v17, %v1884_v23 }
 0x152   : > { %v1658_v45 = vadd.f32 %v3660_v57, %v1657_v56 }
 0x153   : > { %v1737_v24 = vmax.f32 %v1663_v44, 0.0  ;;  %v2178_v52 = vadd.f32 %v2170_v46, %v2142_v54  ;;  %v1964_v16 = vadd.f32 %v1956_v36, %v1928_v3 }
 0x154   : > { %v1736_v37 = vmax.f32 %v1658_v45, 0.0 }
 0x155   : > { %v1769_v53 = vmin.f32 %v1737_v24, 6.0  ;;  %v2193_v15 = vadd.f32 %v3727_v60, %v2178_v52 }
 0x156   : > { %v1768_v61 = vmin.f32 %v1736_v37, 6.0  ;;  %v1975_v63 = vld [vmem:[#allocation3 + $0xa8] ss:$2 sm:$0xff]  ;;  %v2011_v18 = vld [vmem:[#allocation3 + $0xa9] ss:$2 sm:$0xff] }
 0x157   : > { %1848 = vst.msk [vmem:[#allocation3 + $0x111] sm:$0xff] %vm1780_vm3, %v1769_v53  ;;  %v2201_v41 = vmax.f32 %v2193_v15, 0.0  ;;  %v1991_v50 = vmul.f32 %v3687_v11, %v1975_v63  ;;  %v2027_v6 = vmul.f32 %v3690_v31, %v2011_v18  ;;  %v2047_v21 = vld [vmem:[#allocation3 + $0xaa] ss:$2 sm:$0xff] }
 0x158   : > { %1847 = vst.msk [vmem:[#allocation3 + $0x109] sm:$0xff] %vm1780_vm3, %v1768_v61  ;;  %v2063_v14 = vmul.f32 %v3697_v43, %v2047_v21 }
 0x159   : > { %v2618_v47 = vpop.f32.mrb[14].mxu0  ;;  %v2209_v22 = vmin.f32 %v2201_v41, 6.0  ;;  %v1999_v19 = vadd.f32 %v1991_v50, %v1964_v16 }
 0x15a   : > { %v1633_v59 = vadd.f32 %v2618_v47, %v3660_v57  ;;  %v1627_v10 = vpop.f32.mrb[15].mxu0 }
 0x15b   : > { %v1628_v0 = vadd.f32 %v3660_v57, %v1627_v10  ;;  %2654 = vmatprep.mubr.msk.f32.mxu1 %vm1780_vm3, %v2209_v22  ;;  %v2035_v42 = vadd.f32 %v2027_v6, %v1999_v19 }
 0x15c   : > { %v1731_v39 = vmax.f32 %v1633_v59, 0.0 }
 0x15d   : > { %v1730_v38 = vmax.f32 %v1628_v0, 0.0  ;;  %v2071_v27 = vadd.f32 %v2063_v14, %v2035_v42 }
 0x15e   : > { %v1763_v25 = vmin.f32 %v1731_v39, 6.0 }
 0x15f   : > { %v1762_v29 = vmin.f32 %v1730_v38, 6.0 }
 0x160   : > { %1842 = vst.msk [vmem:[#allocation3 + $0xc9] sm:$0xff] %vm1780_vm3, %v1763_v25 }
 0x161   : > { %1841 = vst.msk [vmem:[#allocation3 + $0xc1] sm:$0xff] %vm1780_vm3, %v1762_v29 }
 0x162   : > { %v2630_v35 = vpop.f32.mrb[2].mxu1 }
 0x163   : > { %v1673_v12 = vadd.f32 %v2630_v35, %v3660_v57  ;;  %v1667_v13 = vpop.f32.mrb[3].mxu1 }
 0x164   : > { %v1668_v49 = vadd.f32 %v3660_v57, %v1667_v13 }
 0x165   : > { %v1739_v4 = vmax.f32 %v1673_v12, 0.0 }
 0x166   : > { %v1738_v9 = vmax.f32 %v1668_v49, 0.0 }
 0x167   : > { %v1771_v20 = vmin.f32 %v1739_v4, 6.0 }
 0x168   : > { %v1770_v32 = vmin.f32 %v1738_v9, 6.0  ;;  %v2083_v2 = vld [vmem:[#allocation3 + $0xc0] ss:$2 sm:$0xff]  ;;  %v2119_v1 = vld [vmem:[#allocation3 + $0xc1] ss:$2 sm:$0xff] }
 0x169   : > { %1850 = vst.msk [vmem:[#allocation3 + $0x129] sm:$0xff] %vm1780_vm3, %v1771_v20  ;;  %v2099_v26 = vmul.f32 %v3706_v7, %v2083_v2  ;;  %v2155_v33 = vld [vmem:[#allocation3 + $0xc2] ss:$2 sm:$0xff]  ;;  %v2135_v34 = vmul.f32 %v3709_v51, %v2119_v1  ;;  %v1906_v15 = vld [vmem:[#allocation3 + $0xc1] ss:$2 sm:$0xff] }
 0x16a   : > { %1849 = vst.msk [vmem:[#allocation3 + $0x121] sm:$0xff] %vm1780_vm3, %v1770_v32  ;;  %v2171_v45 = vmul.f32 %v3717_v30, %v2155_v33  ;;  %v1870_v61 = vld [vmem:[#allocation3 + $0xc0] ss:$2 sm:$0xff]  ;;  %v1921_v59 = vmul.f32 %v3671_v28, %v1906_v15 }
 0x16b   : > { %v2621_v58 = vpop.f32.mrb[16].mxu0  ;;  %v2107_v62 = vadd.f32 %v2099_v26, %v2071_v27  ;;  %v1885_v36 = vmul.f32 %v3668_v40, %v1870_v61  ;;  %v1942_v16 = vld [vmem:[#allocation3 + $0xc2] ss:$2 sm:$0xff] }
 0x16c   : > { %v1643_v48 = vadd.f32 %v2621_v58, %v3660_v57  ;;  %v1637_v55 = vpop.f32.mrb[17].mxu0  ;;  %v1957_v25 = vmul.f32 %v3676_v8, %v1942_v16 }
 0x16d   : > { %v1638_v44 = vadd.f32 %v3660_v57, %v1637_v55  ;;  %v2143_v56 = vadd.f32 %v2135_v34, %v2107_v62  ;;  %v1929_v50 = vadd.f32 %v1921_v59, %v1885_v36 }
 0x16e   : > { %v1733_v54 = vmax.f32 %v1643_v48, 0.0 }
 0x16f   : > { %v1732_v46 = vmax.f32 %v1638_v44, 0.0  ;;  %v2179_v24 = vadd.f32 %v2171_v45, %v2143_v56  ;;  %v1965_v21 = vadd.f32 %v1957_v25, %v1929_v50 }
 0x170   : > { %v1765_v23 = vmin.f32 %v1733_v54, 6.0 }
 0x171   : > { %v1764_v17 = vmin.f32 %v1732_v46, 6.0  ;;  %v2194_v37 = vadd.f32 %v3727_v60, %v2179_v24  ;;  %v1874_v18 = vld [vmem:[#allocation3 + $0x120] ss:$2 sm:$0xff]  ;;  %v1910_v29 = vld [vmem:[#allocation3 + $0x121] ss:$2 sm:$0xff] }
 0x172   : > { %1844 = vst.msk [vmem:[#allocation3 + $0xe1] sm:$0xff] %vm1780_vm3, %v1765_v23  ;;  %v1887_v42 = vmul.f32 %v3668_v40, %v1874_v18  ;;  %v1923_v49 = vmul.f32 %v3671_v28, %v1910_v29  ;;  %v1946_v14 = vld [vmem:[#allocation3 + $0x122] ss:$2 sm:$0xff] }
 0x173   : > { %1843 = vst.msk [vmem:[#allocation3 + $0xd9] sm:$0xff] %vm1780_vm3, %v1764_v17  ;;  %v2202_v52 = vmax.f32 %v2194_v37, 0.0  ;;  %v1959_v1 = vmul.f32 %v3676_v8, %v1946_v14 }
 0x174   : > { %v2633_v53 = vpop.f32.mrb[4].mxu1  ;;  %v1931_v2 = vadd.f32 %v1923_v49, %v1887_v42 }
 0x175   : > { %v1683_v5 = vadd.f32 %v2633_v53, %v3660_v57  ;;  %v1677_v3 = vpop.f32.mrb[5].mxu1  ;;  %v2210_v41 = vmin.f32 %v2202_v52, 6.0 }
 0x176   : > { %v1678_v63 = vadd.f32 %v3660_v57, %v1677_v3  ;;  %v1967_v56 = vadd.f32 %v1959_v1, %v1931_v2  ;;  %v2087_v1 = vld [vmem:[#allocation3 + $0x120] ss:$2 sm:$0xff] }
 0x177   : > { %v1741_v47 = vmax.f32 %v1683_v5, 0.0  ;;  %2655 = vmatmul.mubr.msk.f32.gmra.mrb[14].mxu1 %vm1780_vm3, %v2210_v41 }
 0x178   : > { %v1740_v10 = vmax.f32 %v1678_v63, 0.0 }
 0x179   : > { %v1773_v22 = vmin.f32 %v1741_v47, 6.0 }
 0x17a   : > { %v1772_v0 = vmin.f32 %v1740_v10, 6.0  ;;  %v1977_v39 = vld [vmem:[#allocation3 + $0xd8] ss:$2 sm:$0xff]  ;;  %v2013_v20 = vld [vmem:[#allocation3 + $0xd9] ss:$2 sm:$0xff] }
 0x17b   : > { %1852 = vst.msk [vmem:[#allocation3 + $0x141] sm:$0xff] %vm1780_vm3, %v1773_v22  ;;  %v1992_v12 = vmul.f32 %v3687_v11, %v1977_v39  ;;  %v2028_v26 = vmul.f32 %v3690_v31, %v2013_v20  ;;  %v2049_v62 = vld [vmem:[#allocation3 + $0xda] ss:$2 sm:$0xff]  ;;  %v2051_v20 = vld [vmem:[#allocation3 + $0x10a] ss:$2 sm:$0xff] }
 0x17c   : > { %1851 = vst.msk [vmem:[#allocation3 + $0x139] sm:$0xff] %vm1780_vm3, %v1772_v0  ;;  %v2064_v46 = vmul.f32 %v3697_v43, %v2049_v62  ;;  %v1979_v39 = vld [vmem:[#allocation3 + $0x108] ss:$2 sm:$0xff] }
 0x17d   : > { %v2624_v38 = vpop.f32.mrb[18].mxu0  ;;  %v2000_v32 = vadd.f32 %v1992_v12, %v1965_v21 }
 0x17e   : > { %v1653_v19 = vadd.f32 %v2624_v38, %v3660_v57  ;;  %v1647_v6 = vpop.f32.mrb[19].mxu0 }
 0x17f   : > { %v1648_v35 = vadd.f32 %v3660_v57, %v1647_v6  ;;  %v2036_v55 = vadd.f32 %v2028_v26, %v2000_v32 }
 0x180   : > { %v1735_v13 = vmax.f32 %v1653_v19, 0.0 }
 0x181   : > { %v1734_v4 = vmax.f32 %v1648_v35, 0.0  ;;  %v2072_v37 = vadd.f32 %v2064_v46, %v2036_v55  ;;  %v2065_v55 = vmul.f32 %v3697_v43, %v2051_v20 }
 0x182   : > { %v1767_v9 = vmin.f32 %v1735_v13, 6.0  ;;  %v2015_v13 = vld [vmem:[#allocation3 + $0x109] ss:$2 sm:$0xff] }
 0x183   : > { %v1766_v27 = vmin.f32 %v1734_v4, 6.0  ;;  %v1981_v33 = vld [vmem:[#allocation3 + $0x138] ss:$2 sm:$0xff]  ;;  %v2017_v24 = vld [vmem:[#allocation3 + $0x139] ss:$2 sm:$0xff]  ;;  %v1993_v4 = vmul.f32 %v3687_v11, %v1979_v39  ;;  %v2029_v2 = vmul.f32 %v3690_v31, %v2015_v13 }
 0x184   : > { %1846 = vst.msk [vmem:[#allocation3 + $0xf9] sm:$0xff] %vm1780_vm3, %v1767_v9  ;;  %v1994_v45 = vmul.f32 %v3687_v11, %v1981_v33  ;;  %v2053_v52 = vld [vmem:[#allocation3 + $0x13a] ss:$2 sm:$0xff]  ;;  %v2030_v3 = vmul.f32 %v3690_v31, %v2017_v24 }
 0x185   : > { %1845 = vst.msk [vmem:[#allocation3 + $0xf1] sm:$0xff] %vm1780_vm3, %v1766_v27  ;;  %v2066_v38 = vmul.f32 %v3697_v43, %v2053_v52 }
 0x186   : > { %v2636_v58 = vpop.f32.mrb[6].mxu1  ;;  %v2002_v5 = vadd.f32 %v1994_v45, %v1967_v56 }
 0x187   : > { %v1693_v34 = vadd.f32 %v2636_v58, %v3660_v57  ;;  %v1687_v48 = vpop.f32.mrb[7].mxu1 }
 0x188   : > { %v1688_v44 = vadd.f32 %v3660_v57, %v1687_v48  ;;  %v2038_v6 = vadd.f32 %v2030_v3, %v2002_v5 }
 0x189   : > { %v1743_v54 = vmax.f32 %v1693_v34, 0.0 }
 0x18a   : > { %v1742_v23 = vmax.f32 %v1688_v44, 0.0  ;;  %v2074_v26 = vadd.f32 %v2066_v38, %v2038_v6 }
 0x18b   : > { %v1775_v17 = vmin.f32 %v1743_v54, 6.0 }
 0x18c   : > { %v1774_v53 = vmin.f32 %v1742_v23, 6.0  ;;  %v2085_v61 = vld [vmem:[#allocation3 + $0xf0] ss:$2 sm:$0xff]  ;;  %v2121_v15 = vld [vmem:[#allocation3 + $0xf1] ss:$2 sm:$0xff] }
 0x18d   : > { %1854 = vst.msk [vmem:[#allocation3 + $0x159] sm:$0xff] %vm1780_vm3, %v1775_v17  ;;  %v2100_v41 = vmul.f32 %v3706_v7, %v2085_v61  ;;  %v1872_v63 = vld [vmem:[#allocation3 + $0xf0] ss:$2 sm:$0xff]  ;;  %v1908_v47 = vld [vmem:[#allocation3 + $0xf1] ss:$2 sm:$0xff]  ;;  %v2136_v50 = vmul.f32 %v3709_v51, %v2121_v15  ;;  %v2101_v15 = vmul.f32 %v3706_v7, %v2087_v1 }
 0x18e   : > { %1853 = vst.msk [vmem:[#allocation3 + $0x151] sm:$0xff] %vm1780_vm3, %v1774_v53  ;;  %v2157_v36 = vld [vmem:[#allocation3 + $0xf2] ss:$2 sm:$0xff]  ;;  %v1886_v59 = vmul.f32 %v3668_v40, %v1872_v63  ;;  %v1922_v10 = vmul.f32 %v3671_v28, %v1908_v47  ;;  %v2123_v23 = vld [vmem:[#allocation3 + $0x121] ss:$2 sm:$0xff] }
 0x18f   : > { %v1944_v22 = vld [vmem:[#allocation3 + $0xf2] ss:$2 sm:$0xff]  ;;  %v2639_v0 = vpop.f32.mrb[8].mxu1  ;;  %v2108_v16 = vadd.f32 %v2100_v41, %v2072_v37  ;;  %v2172_v12 = vmul.f32 %v3717_v30, %v2157_v36  ;;  %v2159_v36 = vld [vmem:[#allocation3 + $0x122] ss:$2 sm:$0xff] }
 0x190   : > { %v1703_v25 = vadd.f32 %v2639_v0, %v3660_v57  ;;  %v1697_v18 = vpop.f32.mrb[9].mxu1  ;;  %v1930_v29 = vadd.f32 %v1922_v10, %v1886_v59  ;;  %v1958_v19 = vmul.f32 %v3676_v8, %v1944_v22  ;;  %v2173_v38 = vmul.f32 %v3717_v30, %v2159_v36 }
 0x191   : > { %v1698_v35 = vadd.f32 %v3660_v57, %v1697_v18  ;;  %v2144_v21 = vadd.f32 %v2136_v50, %v2108_v16 }
 0x192   : > { %v1745_v42 = vmax.f32 %v1703_v25, 0.0  ;;  %v1966_v49 = vadd.f32 %v1958_v19, %v1930_v29 }
 0x193   : > { %v1744_v14 = vmax.f32 %v1698_v35, 0.0  ;;  %v2180_v9 = vadd.f32 %v2172_v12, %v2144_v21 }
 0x194   : > { %v1777_v27 = vmin.f32 %v1745_v42, 6.0  ;;  %v2001_v32 = vadd.f32 %v1993_v4, %v1966_v49 }
 0x195   : > { %v1776_v33 = vmin.f32 %v1744_v14, 6.0  ;;  %v2195_v58 = vadd.f32 %v3727_v60, %v2180_v9  ;;  %v2089_v62 = vld [vmem:[#allocation3 + $0x150] ss:$2 sm:$0xff]  ;;  %v2125_v34 = vld [vmem:[#allocation3 + $0x151] ss:$2 sm:$0xff] }
 0x196   : > { %1856 = vst.msk [vmem:[#allocation3 + $0x171] sm:$0xff] %vm1780_vm3, %v1777_v27  ;;  %v2037_v48 = vadd.f32 %v2029_v2, %v2001_v32  ;;  %v2102_v44 = vmul.f32 %v3706_v7, %v2089_v62  ;;  %v2138_v56 = vmul.f32 %v3709_v51, %v2125_v34  ;;  %v2161_v45 = vld [vmem:[#allocation3 + $0x152] ss:$2 sm:$0xff]  ;;  %v1912_v46 = vld [vmem:[#allocation3 + $0x151] ss:$2 sm:$0xff] }
 0x197   : > { %v1876_v54 = vld [vmem:[#allocation3 + $0x150] ss:$2 sm:$0xff]  ;;  %1855 = vst.msk [vmem:[#allocation3 + $0x169] sm:$0xff] %vm1780_vm3, %v1776_v33  ;;  %v2203_v24 = vmax.f32 %v2195_v58, 0.0  ;;  %v1924_v37 = vmul.f32 %v3671_v28, %v1912_v46  ;;  %v2174_v3 = vmul.f32 %v3717_v30, %v2161_v45  ;;  %v2137_v28 = vmul.f32 %v3709_v51, %v2123_v23 }
 0x198   : > { %v1888_v17 = vmul.f32 %v3668_v40, %v1876_v54  ;;  %v1948_v52 = vld [vmem:[#allocation3 + $0x152] ss:$2 sm:$0xff]  ;;  %v2642_v53 = vpop.f32.mrb[10].mxu1  ;;  %v2073_v61 = vadd.f32 %v2065_v55, %v2037_v48  ;;  %v2110_v5 = vadd.f32 %v2102_v44, %v2074_v26 }
 0x199   : > { %v1713_v41 = vadd.f32 %v2642_v53, %v3660_v57  ;;  %v1707_v63 = vpop.f32.mrb[11].mxu1  ;;  %v2211_v47 = vmin.f32 %v2203_v24, 6.0  ;;  %v1960_v10 = vmul.f32 %v3676_v8, %v1948_v52 }
 0x19a   : > { %v1932_v59 = vadd.f32 %v1924_v37, %v1888_v17  ;;  %v1708_v40 = vadd.f32 %v3660_v57, %v1707_v63  ;;  %v2109_v22 = vadd.f32 %v2101_v15, %v2073_v61  ;;  %v2146_v0 = vadd.f32 %v2138_v56, %v2110_v5  ;;  %v2535_v56 = vld [vmem:[%s3873_s8] ss:$0 sm:$0xff] }
 0x19b   : > { %v1747_v16 = vmax.f32 %v1713_v41, 0.0  ;;  %2657 = vmatprep.mubr.msk.f32.mxu1 %vm1780_vm3, %v2211_v47 }
 0x19c   : > { %v1746_v50 = vmax.f32 %v1708_v40, 0.0  ;;  %v2145_v39 = vadd.f32 %v2137_v28, %v2109_v22  ;;  %v2182_v25 = vadd.f32 %v2174_v3, %v2146_v0  ;;  %v1968_v29 = vadd.f32 %v1960_v10, %v1932_v59 }
 0x19d   : > { %v1779_v18 = vmin.f32 %v1747_v16, 6.0 }
 0x19e   : > { %v1778_v19 = vmin.f32 %v1746_v50, 6.0  ;;  %v2181_v6 = vadd.f32 %v2173_v38, %v2145_v39  ;;  %v2197_v8 = vadd.f32 %v3727_v60, %v2182_v25  ;;  %v1983_v35 = vld [vmem:[#allocation3 + $0x168] ss:$2 sm:$0xff]  ;;  %v2019_v57 = vld [vmem:[#allocation3 + $0x169] ss:$2 sm:$0xff] }
 0x19f   : > { %1858 = vst.msk [vmem:[#allocation3 + $0x189] sm:$0xff] %vm1780_vm3, %v1779_v18  ;;  %v1995_v21 = vmul.f32 %v3687_v11, %v1983_v35  ;;  %v2031_v12 = vmul.f32 %v3690_v31, %v2019_v57  ;;  %v2055_v13 = vld [vmem:[#allocation3 + $0x16a] ss:$2 sm:$0xff] }
 0x1a0   : > { %1857 = vst.msk [vmem:[#allocation3 + $0x181] sm:$0xff] %vm1780_vm3, %v1778_v19  ;;  %v2196_v42 = vadd.f32 %v3727_v60, %v2181_v6  ;;  %v2205_v49 = vmax.f32 %v2197_v8, 0.0  ;;  %v2067_v9 = vmul.f32 %v3697_v43, %v2055_v13 }
 0x1a1   : > { %v2003_v4 = vadd.f32 %v1995_v21, %v1968_v29 }
 0x1a2   : > { %v2204_v14 = vmax.f32 %v2196_v42, 0.0  ;;  %v2213_v32 = vmin.f32 %v2205_v49, 6.0 }
 0x1a3   : > { %v2039_v20 = vadd.f32 %v2031_v12, %v2003_v4 }
 0x1a4   : > { %v2212_v27 = vmin.f32 %v2204_v14, 6.0 }
 0x1a5   : > { %v2075_v2 = vadd.f32 %v2067_v9, %v2039_v20 }
 0x1a6   : > { %2658 = vmatmul.mubr.msk.f32.gmra.mrb[16].mxu1 %vm1780_vm3, %v2212_v27 }
 0x1a7   : > { %2660 = vmatprep.mubr.msk.f32.mxu1 %vm1780_vm3, %v2213_v32  ;;  %v2091_v11 = vld [vmem:[#allocation3 + $0x180] ss:$2 sm:$0xff]  ;;  %v2127_v31 = vld [vmem:[#allocation3 + $0x181] ss:$2 sm:$0xff] }
 0x1a8   : > { %v2163_v1 = vld [vmem:[#allocation3 + $0x182] ss:$2 sm:$0xff]  ;;  %v2103_v26 = vmul.f32 %v3706_v7, %v2091_v11  ;;  %v2139_v33 = vmul.f32 %v3709_v51, %v2127_v31 }
 0x1a9   : > { %v2175_v62 = vmul.f32 %v3717_v30, %v2163_v1 }
 0x1aa   : > { %v2111_v58 = vadd.f32 %v2103_v26, %v2075_v2 }
 0x1ac   : > { %v2147_v34 = vadd.f32 %v2139_v33, %v2111_v58 }
 0x1ae   : > { %v2183_v43 = vadd.f32 %v2175_v62, %v2147_v34 }
 0x1b0   : > { %v2198_v48 = vadd.f32 %v3727_v60, %v2183_v43 }
 0x1b2   : > { %v2206_v55 = vmax.f32 %v2198_v48, 0.0 }
 0x1b4   : > { %v2214_v44 = vmin.f32 %v2206_v55, 6.0 }
 0x1b6   : > { %2661 = vmatmul.mubr.msk.f32.gmra.mrb[18].mxu1 %vm1780_vm3, %v2214_v44 }
 0x21d   : > { %v2653_v45 = vpop.f32.mrb[12].mxu1 }
 0x21e   : > { %v2316_v54 = vpop.f32.mrb[13].mxu1  ;;  %v2322_v51 = vadd.f32 %v2653_v45, %v2535_v56 }
 0x21f   : > { %v2317_v7 = vadd.f32 %v2535_v56, %v2316_v54 }
 0x221   : > { %2355 = vxpose.xlu0.b32.start [1/8] (short) (narrow) %v2317_v7, 16 }
 0x225   : > { %2356 = vxpose.xlu0.b32.cont [2/8] (short) (narrow) %v2322_v51, 16 }
 0x24a   : > { %v2656_v46 = vpop.f32.mrb[14].mxu1 }
 0x24b   : > { %v2326_v30 = vpop.f32.mrb[15].mxu1  ;;  %v2332_v60 = vadd.f32 %v2656_v46, %v2535_v56 }
 0x24c   : > { %v2327_v24 = vadd.f32 %v2535_v56, %v2326_v30 }
 0x24e   : > { %2357 = vxpose.xlu0.b32.cont [3/8] (short) (narrow) %v2327_v24, 16 }
 0x252   : > { %2358 = vxpose.xlu0.b32.cont [4/8] (short) (narrow) %v2332_v60, 16 }
 0x279   : > { %v2659_v23 = vpop.f32.mrb[16].mxu1 }
 0x27a   : > { %v2336_v17 = vpop.f32.mrb[17].mxu1  ;;  %v2342_v52 = vadd.f32 %v2659_v23, %v2535_v56 }
 0x27b   : > { %v2337_v37 = vadd.f32 %v2535_v56, %v2336_v17 }
 0x27d   : > { %2359 = vxpose.xlu0.b32.cont [5/8] (short) (narrow) %v2337_v37, 16 }
 0x281   : > { %2360 = vxpose.xlu0.b32.cont [6/8] (short) (narrow) %v2342_v52, 16 }
 0x289   : > { %v2662_v53 = vpop.f32.mrb[18].mxu1 }
 0x28a   : > { %v2346_v61 = vpop.f32.mrb[19].mxu1  ;;  %v2352_v5 = vadd.f32 %v2662_v53, %v2535_v56 }
 0x28b   : > { %v2347_v15 = vadd.f32 %v2535_v56, %v2346_v61 }
 0x28d   : > { %2361 = vxpose.xlu0.b32.cont [7/8] (short) (narrow) %v2347_v15, 16 }
 0x291   : > { %2362 = vxpose.xlu0.b32.end [8/8] (short) (narrow) %v2352_v5, 16 }
 0x2f5   : > { %v2371_v3 = vpop.trf.xlu0 }
 0x2f6   : > { %2388 = vst.msk [vmem:[%s332_s13] sm:$0xff] %vm2387_vm6, %v2371_v3 }
 0x2f9   : > { %v2372_v41 = vpop.trf.xlu0 }
 0x2fa   : > { %2389 = vst.msk [vmem:[%s332_s13 + $0x8] sm:$0xff] %vm2387_vm6, %v2372_v41 }
 0x2fb PF: > { %s19_s30 = sadd.s32 1, %s2689_s30  }
 0x2fc   : > { %p16_p4 = scmp.ge.s32.totalorder %s19_s30, 4  }
 0x2fe   :  { %18 = sbr.rel (!%p16_p4) target bundleno = 1 (0x1), region = 161 }

</bundles_post_ra>
